<compile_context>
chip_gen: v6e
topology: v6e:2x2x1
jax: 0.10.0
libtpu: 0.0.40
codegen_flags: <defaults>
</compile_context>

<pallas_src>
import functools

import jax
import jax.numpy as jnp
from jax.experimental import pallas as pl
from jax.experimental.pallas import tpu as pltpu


_VMEM_LIMIT = 32 * 1024 * 1024  # safe on v5e/v6e (128 MiB) and v7x (64 MiB physical)


def _round_up(x, m):
    return ((x + m - 1) // m) * m


# ----------------------------------------------------------------------------
# Pallas kernels
# ----------------------------------------------------------------------------
def _matmul_bias_act_kernel(x_ref, w_ref, b_ref, o_ref, acc_ref, *, act):
    """Tiled matmul with K-axis accumulation: out = act(x @ w + b)."""
    k = pl.program_id(2)

    @pl.when(k == 0)
    def _init():
        acc_ref[...] = jnp.zeros_like(acc_ref)

    acc_ref[...] += jnp.dot(x_ref[...], w_ref[...],
                            preferred_element_type=jnp.float32)

    @pl.when(k == pl.num_programs(2) - 1)
    def _finish():
        y = acc_ref[...] + b_ref[...]        # b is (1, tn), broadcasts over rows
        if act == "relu":
            y = jnp.maximum(y, 0.0)
        elif act == "sigmoid":
            y = jax.nn.sigmoid(y)
        o_ref[...] = y.astype(o_ref.dtype)


def _fc_dec_reparam_kernel(mu_ref, lv_ref, eps_ref, w_ref, b_ref, o_ref):
    """Fused reparameterization + decoder fc: out = (mu + eps*exp(.5*lv)) @ w + b."""
    z = mu_ref[...] + eps_ref[...] * jnp.exp(0.5 * lv_ref[...])
    y = jnp.dot(z.astype(jnp.bfloat16), w_ref[...],
                preferred_element_type=jnp.float32) + b_ref[...]
    o_ref[...] = y.astype(o_ref.dtype)


# ----------------------------------------------------------------------------
# Pallas wrappers
# ----------------------------------------------------------------------------
def _pick_tiles(M, N, K):
    # <=256 wide M/N tiles, K tile up to 512 (or the whole K if it rounds to
    # <=1024).  Blocks either equal the (padded) full dim or are multiples of
    # (8,128), so the TPU layout constraint always holds.
    tm = min(256, _round_up(M, 8))
    tn = min(256, _round_up(N, 128))
    kk = _round_up(K, 128)
    tk = kk if kk <= 1024 else 512
    return tm, tn, tk


def matmul_bias_act(x, w, b, act="none", out_dtype=jnp.float32):
    """out = act(x @ w + b); x:(M,K), w:(K,N), b:(N,).  bf16 MXU, f32 accumulate."""
    M, K = x.shape
    K2, N = w.shape
    assert K == K2, (K, K2)
    tm, tn, tk = _pick_tiles(M, N, K)
    Mp, Np, Kp = _round_up(M, tm), _round_up(N, tn), _round_up(K, tk)

    x_p = jnp.pad(x.astype(jnp.bfloat16), ((0, Mp - M), (0, Kp - K)))
    w_p = jnp.pad(w.astype(jnp.bfloat16), ((0, Kp - K), (0, Np - N)))
    b_p = jnp.pad(b.astype(jnp.float32), (0, Np - N)).reshape(1, Np)

    grid = (Mp // tm, Np // tn, Kp // tk)
    kernel = functools.partial(_matmul_bias_act_kernel, act=act)
    out = pl.pallas_call(
        kernel,
        out_shape=jax.ShapeDtypeStruct((Mp, Np), out_dtype),
        grid=grid,
        in_specs=[
            pl.BlockSpec((tm, tk), lambda i, j, k: (i, k)),
            pl.BlockSpec((tk, tn), lambda i, j, k: (k, j)),
            pl.BlockSpec((1, tn), lambda i, j, k: (0, j)),
        ],
        out_specs=pl.BlockSpec((tm, tn), lambda i, j, k: (i, j)),
        scratch_shapes=[pltpu.VMEM((tm, tn), jnp.float32)],
        compiler_params=pltpu.CompilerParams(
            dimension_semantics=("parallel", "parallel", "arbitrary"),
            vmem_limit_bytes=_VMEM_LIMIT),
    )(x_p, w_p, b_p)
    return out[:M, :N]


def fc_dec_with_reparam(mu, logvar, eps, w, b, out_dtype=jnp.float32):
    """d = (mu + eps*exp(0.5*logvar)) @ w + b, reparam fused into the kernel."""
    B, L = mu.shape
    L2, N = w.shape
    assert L == L2
    Bp = _round_up(B, 8)
    Lp = _round_up(L, 128)
    tn = min(256, _round_up(N, 128))
    Np = _round_up(N, tn)

    def pad2(a, r, c, dt):
        return jnp.pad(a.astype(dt), ((0, r - a.shape[0]), (0, c - a.shape[1])))

    mu_p = pad2(mu, Bp, Lp, jnp.float32)
    lv_p = pad2(logvar, Bp, Lp, jnp.float32)
    eps_p = pad2(eps, Bp, Lp, jnp.float32)
    w_p = pad2(w, Lp, Np, jnp.bfloat16)
    b_p = jnp.pad(b.astype(jnp.float32), (0, Np - N)).reshape(1, Np)

    grid = (Bp // Bp, Np // tn)  # (1, Ntiles); M is tiny (batch)
    out = pl.pallas_call(
        _fc_dec_reparam_kernel,
        out_shape=jax.ShapeDtypeStruct((Bp, Np), out_dtype),
        grid=grid,
        in_specs=[
            pl.BlockSpec((Bp, Lp), lambda i, j: (i, 0)),
            pl.BlockSpec((Bp, Lp), lambda i, j: (i, 0)),
            pl.BlockSpec((Bp, Lp), lambda i, j: (i, 0)),
            pl.BlockSpec((Lp, tn), lambda i, j: (0, j)),
            pl.BlockSpec((1, tn), lambda i, j: (0, j)),
        ],
        out_specs=pl.BlockSpec((Bp, tn), lambda i, j: (i, j)),
        compiler_params=pltpu.CompilerParams(
            dimension_semantics=("parallel", "parallel"),
            vmem_limit_bytes=_VMEM_LIMIT),
    )(mu_p, lv_p, eps_p, w_p, b_p)
    return out[:B, :N]


# ----------------------------------------------------------------------------
# Conv / deconv lowering (NHWC; glue slicing in JAX, compute in Pallas matmul)
# ----------------------------------------------------------------------------
def _im2col_nhwc(x, k, stride, pad):
    """x: (B,H,W,C) -> (B*Ho*Wo, k*k*C) with K order (ky, kx, c)."""
    B, H, W, C = x.shape
    Ho = (H + 2 * pad - k) // stride + 1
    Wo = (W + 2 * pad - k) // stride + 1
    xp = jnp.pad(x, ((0, 0), (pad, pad), (pad, pad), (0, 0)))
    cols = []
    for ky in range(k):
        for kx in range(k):
            cols.append(xp[:, ky:ky + stride * (Ho - 1) + 1:stride,
                              kx:kx + stride * (Wo - 1) + 1:stride, :])
    patches = jnp.concatenate(cols, axis=-1)            # (B,Ho,Wo,k*k*C)
    return patches.reshape(B * Ho * Wo, k * k * C), Ho, Wo


def conv2d_nhwc(x, w_packed, b, *, k, stride, pad, act, out_dtype=jnp.float32):
    """PyTorch-semantics Conv2d in NHWC.  w_packed: (k*k*Cin, Cout)."""
    B = x.shape[0]
    patches, Ho, Wo = _im2col_nhwc(x, k, stride, pad)
    y = matmul_bias_act(patches, w_packed, b, act, out_dtype)
    Cout = w_packed.shape[1]
    return y.reshape(B, Ho, Wo, Cout)


def conv_transpose2d_subpixel(x, w_sub, b_sub, *, act, out_dtype=jnp.float32):
    """ConvTranspose2d(k=3, s=2, p=1, output_padding=1) as sub-pixel conv.

    x: (B,H,W,Cin) NHWC.  w_sub: (4*Cin, 4*Cout) packed so that a stride-1 2x2
    conv (high-side padded) followed by depth-to-space reproduces the deconv.
    """
    B, H, W, C = x.shape
    Cout = w_sub.shape[1] // 4
    xp = jnp.pad(x, ((0, 0), (0, 1), (0, 1), (0, 0)))
    cols = [xp[:, dy:dy + H, dx:dx + W, :] for dy in (0, 1) for dx in (0, 1)]
    patches = jnp.concatenate(cols, axis=-1).reshape(B * H * W, 4 * C)
    y = matmul_bias_act(patches, w_sub, b_sub, act, out_dtype)   # (B*H*W, 4*Cout)
    y = y.reshape(B, H, W, 2, 2, Cout)                           # (..., r, s, co)
    y = y.transpose(0, 1, 3, 2, 4, 5).reshape(B, 2 * H, 2 * W, Cout)
    return y


# ----------------------------------------------------------------------------
# Parameters: PyTorch-layout init + one-time packing into kernel layout
# ----------------------------------------------------------------------------
def _conv_out(h):            # k=3, s=2, p=1
    return (h + 2 - 3) // 2 + 1


def init_params(key, freq_bins, time_frames, latent_dim):
    h_enc = _conv_out(_conv_out(_conv_out(freq_bins)))
    w_enc = _conv_out(_conv_out(_conv_out(time_frames)))
    flat_dim = 128 * h_enc * w_enc

    def dense(k, shape, fan_in):
        return jax.random.normal(k, shape, jnp.float32) / jnp.sqrt(fan_in)

    keys = jax.random.split(key, 9)
    params = {
        "enc1_w": dense(keys[0], (32, 1, 3, 3), 1 * 9),    "enc1_b": jnp.zeros((32,)),
        "enc2_w": dense(keys[1], (64, 32, 3, 3), 32 * 9),  "enc2_b": jnp.zeros((64,)),
        "enc3_w": dense(keys[2], (128, 64, 3, 3), 64 * 9), "enc3_b": jnp.zeros((128,)),
        "fc_mu_w": dense(keys[3], (latent_dim, flat_dim), flat_dim),
        "fc_mu_b": jnp.zeros((latent_dim,)),
        "fc_logvar_w": dense(keys[4], (latent_dim, flat_dim), flat_dim),
        "fc_logvar_b": jnp.zeros((latent_dim,)),
        "fc_dec_w": dense(keys[5], (flat_dim, latent_dim), latent_dim),
        "fc_dec_b": jnp.zeros((flat_dim,)),
        "dec1_w": dense(keys[6], (128, 64, 3, 3), 128 * 9), "dec1_b": jnp.zeros((64,)),
        "dec2_w": dense(keys[7], (64, 32, 3, 3), 64 * 9),   "dec2_b": jnp.zeros((32,)),
        "dec3_w": dense(keys[8], (32, 1, 3, 3), 32 * 9),    "dec3_b": jnp.zeros((1,)),
    }
    return params, (h_enc, w_enc, flat_dim)


def _pack_conv_weight(w):                # (Cout,Cin,k,k) -> (k*k*Cin, Cout)
    Cout, Cin, k, _ = w.shape
    return w.transpose(2, 3, 1, 0).reshape(k * k * Cin, Cout)


def _pack_deconv_weight_subpixel(w):     # (Cin,Cout,3,3) -> (4*Cin, 4*Cout)
    Cin, Cout, k, _ = w.shape
    cols = []
    for r in (0, 1):
        for s in (0, 1):
            rows = []
            for dy in (0, 1):
                for dx in (0, 1):
                    ky, kx = r + 1 - 2 * dy, s + 1 - 2 * dx
                    if 0 <= ky < k and 0 <= kx < k:
                        rows.append(w[:, :, ky, kx])
                    else:
                        rows.append(jnp.zeros((Cin, Cout), w.dtype))
            cols.append(jnp.concatenate(rows, axis=0))   # (4*Cin, Cout)
    return jnp.concatenate(cols, axis=1)                 # (4*Cin, 4*Cout)


def pack_params(p, enc_dims, latent_dim):
    """One-time conversion of PyTorch-layout params into kernel-ready layout."""
    h_enc, w_enc, flat_dim = enc_dims
    L = latent_dim
    f32, bf16 = jnp.float32, jnp.bfloat16

    def pk_fc_in(w):   # (L, flat[C,H,W]) -> (flat[H,W,C], L): match NHWC flatten
        return w.reshape(L, 128, h_enc, w_enc).transpose(2, 3, 1, 0).reshape(flat_dim, L)

    packed = {
        "enc1_w": _pack_conv_weight(p["enc1_w"]).astype(bf16), "enc1_b": p["enc1_b"].astype(f32),
        "enc2_w": _pack_conv_weight(p["enc2_w"]).astype(bf16), "enc2_b": p["enc2_b"].astype(f32),
        "enc3_w": _pack_conv_weight(p["enc3_w"]).astype(bf16), "enc3_b": p["enc3_b"].astype(f32),
        # fused mu/logvar heads: single (flat, 2L) matmul
        "heads_w": jnp.concatenate([pk_fc_in(p["fc_mu_w"]),
                                    pk_fc_in(p["fc_logvar_w"])], axis=1).astype(bf16),
        "heads_b": jnp.concatenate([p["fc_mu_b"], p["fc_logvar_b"]]).astype(f32),
        # fc_dec pre-transposed to (L, flat) with columns permuted to NHWC order
        "fc_dec_w": (p["fc_dec_w"].reshape(128, h_enc, w_enc, L)
                     .transpose(3, 1, 2, 0).reshape(L, flat_dim)).astype(bf16),
        "fc_dec_b": (p["fc_dec_b"].reshape(128, h_enc, w_enc)
                     .transpose(1, 2, 0).reshape(flat_dim)).astype(f32),
        "dec1_w": _pack_deconv_weight_subpixel(p["dec1_w"]).astype(bf16),
        "dec1_b": jnp.tile(p["dec1_b"], 4).astype(f32),
        "dec2_w": _pack_deconv_weight_subpixel(p["dec2_w"]).astype(bf16),
        "dec2_b": jnp.tile(p["dec2_b"], 4).astype(f32),
        "dec3_w": _pack_deconv_weight_subpixel(p["dec3_w"]).astype(bf16),
        "dec3_b": jnp.tile(p["dec3_b"], 4).astype(f32),
    }
    return packed


# ----------------------------------------------------------------------------
# Forward pass
# ----------------------------------------------------------------------------
def spectrogram_vae_forward(pp, x, eps, enc_dims, latent_dim, freq_bins, time_frames):
    h_enc, w_enc, flat_dim = enc_dims
    B = x.shape[0]
    bf16 = jnp.bfloat16

    # NCHW -> NHWC once at the boundary; keep activations bf16 between layers.
    h = jnp.transpose(x, (0, 2, 3, 1)).astype(bf16)
    h = conv2d_nhwc(h, pp["enc1_w"], pp["enc1_b"], k=3, stride=2, pad=1, act="relu", out_dtype=bf16)
    h = conv2d_nhwc(h, pp["enc2_w"], pp["enc2_b"], k=3, stride=2, pad=1, act="relu", out_dtype=bf16)
    h = conv2d_nhwc(h, pp["enc3_w"], pp["enc3_b"], k=3, stride=2, pad=1, act="relu", out_dtype=bf16)
    h_flat = h.reshape(B, flat_dim)           # NHWC flatten; heads_w packed to match

    # fused mu/logvar heads: one matmul over the shared activation
    ml = matmul_bias_act(h_flat, pp["heads_w"], pp["heads_b"], act="none",
                         out_dtype=jnp.float32)
    mu = ml[:, :latent_dim]
    logvar = ml[:, latent_dim:2 * latent_dim]

    # reparameterize fused into the decoder fc kernel
    d = fc_dec_with_reparam(mu, logvar, eps, pp["fc_dec_w"], pp["fc_dec_b"],
                            out_dtype=bf16)
    d = d.reshape(B, h_enc, w_enc, 128)       # NHWC (columns packed in HWC order)

    d = conv_transpose2d_subpixel(d, pp["dec1_w"], pp["dec1_b"], act="relu", out_dtype=bf16)
    d = conv_transpose2d_subpixel(d, pp["dec2_w"], pp["dec2_b"], act="relu", out_dtype=bf16)
    out = conv_transpose2d_subpixel(d, pp["dec3_w"], pp["dec3_b"], act="sigmoid",
                                    out_dtype=jnp.float32)

    out = jnp.transpose(out, (0, 3, 1, 2))    # NHWC -> NCHW at the boundary
    if out.shape[-2:] != (freq_bins, time_frames):
        # TODO(synk): XLA bilinear resize (half-pixel centers) approximates
        # torch interpolate(align_corners=False); only hit for odd input dims.
        out = jax.image.resize(out, (B, 1, freq_bins, time_frames), method="bilinear")
    return out, mu, logvar


# ----------------------------------------------------------------------------
if __name__ == "__main__":
    freq_bins, time_frames, latent_dim, batch = 16, 16, 32, 2

    key = jax.random.PRNGKey(0)
    k_params, k_x, k_eps = jax.random.split(key, 3)

    params, enc_dims = init_params(k_params, freq_bins, time_frames, latent_dim)
    packed = pack_params(params, enc_dims, latent_dim)

    x = jax.random.normal(k_x, (batch, 1, freq_bins, time_frames), jnp.float32)
    eps = jax.random.normal(k_eps, (batch, latent_dim), jnp.float32)

    fwd = jax.jit(functools.partial(spectrogram_vae_forward,
                                    enc_dims=enc_dims,
                                    latent_dim=latent_dim,
                                    freq_bins=freq_bins,
                                    time_frames=time_frames))
    out, mu, logvar = fwd(packed, x, eps)
    jax.block_until_ready((out, mu, logvar))

    assert out.shape == (batch, 1, freq_bins, time_frames)
    assert mu.shape == (batch, latent_dim) and logvar.shape == (batch, latent_dim)
    assert bool(jnp.all(jnp.isfinite(out))) and bool(jnp.all((out >= 0) & (out <= 1)))
    print("KERNEL_OK")
</pallas_src>

<mosaic_0001>
module attributes {stable_mosaic.version = 11 : i64} {
  func.func @_matmul_bias_act_kernel(%arg0: i32, %arg1: i32, %arg2: i32, %arg3: memref<128x128xbf16, #tpu.memory_space<vmem>>, %arg4: memref<128x128xbf16, #tpu.memory_space<vmem>>, %arg5: memref<1x128xf32, #tpu.memory_space<vmem>>, %arg6: memref<128x128xbf16, #tpu.memory_space<vmem>>, %arg7: memref<128x128xf32, #tpu.memory_space<vmem>>) attributes {dimension_semantics = [#tpu.dimension_semantics<parallel>, #tpu.dimension_semantics<parallel>, #tpu.dimension_semantics<arbitrary>], iteration_bounds = array<i64: 1, 1, 1>, scalar_prefetch = 0 : i64, scratch_operands = 1 : i64, tpu.core_type = #tpu.core_type<tc>, window_params = [{transform_indices = @transform_0, window_bounds = array<i64: 128, 128>}, {transform_indices = @transform_1, window_bounds = array<i64: 128, 128>}, {transform_indices = @transform_2, window_bounds = array<i64: 1, 128>}, {transform_indices = @transform_3, window_bounds = array<i64: 128, 128>}]} {
    %c0_i32 = arith.constant 0 : i32
    %0 = arith.cmpi eq, %arg2, %c0_i32 : i32
    %1 = arith.extui %0 : i1 to i32
    %c0_i32_0 = arith.constant 0 : i32
    %2 = arith.cmpi ne, %1, %c0_i32_0 : i32
    scf.if %2 {
      %cst_10 = arith.constant 0.000000e+00 : f32
      %12 = vector.broadcast %cst_10 : f32 to vector<128x128xf32>
      %c0_11 = arith.constant 0 : index
      %c0_12 = arith.constant 0 : index
      %13 = vector.load %arg7[%c0_11, %c0_12] : memref<128x128xf32, #tpu.memory_space<vmem>>, vector<128x128xf32>
      tpu.vector_store %arg7[%c0_11, %c0_12], %12 {strides = array<i32>} : memref<128x128xf32, #tpu.memory_space<vmem>>, vector<128x128xf32>,
    } else {
    }
    %c0 = arith.constant 0 : index
    %c0_1 = arith.constant 0 : index
    %3 = vector.load %arg7[%c0, %c0_1] : memref<128x128xf32, #tpu.memory_space<vmem>>, vector<128x128xf32>
    %c0_2 = arith.constant 0 : index
    %c0_3 = arith.constant 0 : index
    %4 = vector.load %arg3[%c0_2, %c0_3] : memref<128x128xbf16, #tpu.memory_space<vmem>>, vector<128x128xbf16>
    %c0_4 = arith.constant 0 : index
    %c0_5 = arith.constant 0 : index
    %5 = vector.load %arg4[%c0_4, %c0_5] : memref<128x128xbf16, #tpu.memory_space<vmem>>, vector<128x128xbf16>
    %cst = arith.constant dense<0.000000e+00> : vector<128x128xf32>
    %6 = tpu.matmul %4, %5, %cst {dimension_numbers = #tpu.dot_dimension_numbers<[1], [0], [0], [1], [0, 0, 1, 1], [], []>} : vector<128x128xbf16>, vector<128x128xbf16>, vector<128x128xf32> -> vector<128x128xf32>
    %7 = arith.addf %3, %6 : vector<128x128xf32>
    %c0_6 = arith.constant 0 : index
    %c0_7 = arith.constant 0 : index
    %8 = vector.load %arg7[%c0_6, %c0_7] : memref<128x128xf32, #tpu.memory_space<vmem>>, vector<128x128xf32>
    tpu.vector_store %arg7[%c0_6, %c0_7], %7 {strides = array<i32>} : memref<128x128xf32, #tpu.memory_space<vmem>>, vector<128x128xf32>,
    %c0_i32_8 = arith.constant 0 : i32
    %9 = arith.cmpi eq, %arg2, %c0_i32_8 : i32
    %10 = arith.extui %9 : i1 to i32
    %c0_i32_9 = arith.constant 0 : i32
    %11 = arith.cmpi ne, %10, %c0_i32_9 : i32
    scf.if %11 {
      %c0_10 = arith.constant 0 : index
      %c0_11 = arith.constant 0 : index
      %12 = vector.load %arg7[%c0_10, %c0_11] : memref<128x128xf32, #tpu.memory_space<vmem>>, vector<128x128xf32>
      %c0_12 = arith.constant 0 : index
      %c0_13 = arith.constant 0 : index
      %13 = vector.load %arg5[%c0_12, %c0_13] : memref<1x128xf32, #tpu.memory_space<vmem>>, vector<1x128xf32>
      %14 = vector.broadcast %13 : vector<1x128xf32> to vector<128x128xf32>
      %15 = arith.addf %12, %14 : vector<128x128xf32>
      %cst_14 = arith.constant 0.000000e+00 : f32
      %16 = vector.broadcast %cst_14 : f32 to vector<128x128xf32>
      %17 = arith.maximumf %15, %16 : vector<128x128xf32>
      %18 = arith.truncf %17 : vector<128x128xf32> to vector<128x128xbf16>
      %c0_15 = arith.constant 0 : index
      %c0_16 = arith.constant 0 : index
      %19 = vector.load %arg6[%c0_15, %c0_16] : memref<128x128xbf16, #tpu.memory_space<vmem>>, vector<128x128xbf16>
      tpu.vector_store %arg6[%c0_15, %c0_16], %18 {strides = array<i32>} : memref<128x128xbf16, #tpu.memory_space<vmem>>, vector<128x128xbf16>,
    } else {
    }
    return
  }
  func.func @transform_0(%arg0: i32, %arg1: i32, %arg2: i32) -> (i32, i32) {
    %c0_i32 = arith.constant 0 : i32
    return %arg0, %arg2 : i32, i32
  }
  func.func @transform_1(%arg0: i32, %arg1: i32, %arg2: i32) -> (i32, i32) {
    %c0_i32 = arith.constant 0 : i32
    return %arg2, %arg1 : i32, i32
  }
  func.func @transform_2(%arg0: i32, %arg1: i32, %arg2: i32) -> (i32, i32) {
    %c0_i32 = arith.constant 0 : i32
    %c0_i32_0 = arith.constant 0 : i32
    return %c0_i32, %arg1 : i32, i32
  }
  func.func @transform_3(%arg0: i32, %arg1: i32, %arg2: i32) -> (i32, i32) {
    %c0_i32 = arith.constant 0 : i32
    return %arg0, %arg1 : i32, i32
  }
}

module attributes {stable_mosaic.version = 11 : i64} {
  func.func @_matmul_bias_act_kernel(%arg0: i32, %arg1: i32, %arg2: i32, %arg3: memref<32x384xbf16, #tpu.memory_space<vmem>>, %arg4: memref<384x128xbf16, #tpu.memory_space<vmem>>, %arg5: memref<1x128xf32, #tpu.memory_space<vmem>>, %arg6: memref<32x128xbf16, #tpu.memory_space<vmem>>, %arg7: memref<32x128xf32, #tpu.memory_space<vmem>>) attributes {dimension_semantics = [#tpu.dimension_semantics<parallel>, #tpu.dimension_semantics<parallel>, #tpu.dimension_semantics<arbitrary>], iteration_bounds = array<i64: 1, 1, 1>, scalar_prefetch = 0 : i64, scratch_operands = 1 : i64, tpu.core_type = #tpu.core_type<tc>, window_params = [{transform_indices = @transform_0, window_bounds = array<i64: 32, 384>}, {transform_indices = @transform_1, window_bounds = array<i64: 384, 128>}, {transform_indices = @transform_2, window_bounds = array<i64: 1, 128>}, {transform_indices = @transform_3, window_bounds = array<i64: 32, 128>}]} {
    %c0_i32 = arith.constant 0 : i32
    %0 = arith.cmpi eq, %arg2, %c0_i32 : i32
    %1 = arith.extui %0 : i1 to i32
    %c0_i32_0 = arith.constant 0 : i32
    %2 = arith.cmpi ne, %1, %c0_i32_0 : i32
    scf.if %2 {
      %cst_10 = arith.constant 0.000000e+00 : f32
      %12 = vector.broadcast %cst_10 : f32 to vector<32x128xf32>
      %c0_11 = arith.constant 0 : index
      %c0_12 = arith.constant 0 : index
      %13 = vector.load %arg7[%c0_11, %c0_12] : memref<32x128xf32, #tpu.memory_space<vmem>>, vector<32x128xf32>
      tpu.vector_store %arg7[%c0_11, %c0_12], %12 {strides = array<i32>} : memref<32x128xf32, #tpu.memory_space<vmem>>, vector<32x128xf32>,
    } else {
    }
    %c0 = arith.constant 0 : index
    %c0_1 = arith.constant 0 : index
    %3 = vector.load %arg7[%c0, %c0_1] : memref<32x128xf32, #tpu.memory_space<vmem>>, vector<32x128xf32>
    %c0_2 = arith.constant 0 : index
    %c0_3 = arith.constant 0 : index
    %4 = vector.load %arg3[%c0_2, %c0_3] : memref<32x384xbf16, #tpu.memory_space<vmem>>, vector<32x384xbf16>
    %c0_4 = arith.constant 0 : index
    %c0_5 = arith.constant 0 : index
    %5 = vector.load %arg4[%c0_4, %c0_5] : memref<384x128xbf16, #tpu.memory_space<vmem>>, vector<384x128xbf16>
    %cst = arith.constant dense<0.000000e+00> : vector<32x128xf32>
    %6 = tpu.matmul %4, %5, %cst {dimension_numbers = #tpu.dot_dimension_numbers<[1], [0], [0], [1], [0, 0, 1, 1], [], []>} : vector<32x384xbf16>, vector<384x128xbf16>, vector<32x128xf32> -> vector<32x128xf32>
    %7 = arith.addf %3, %6 : vector<32x128xf32>
    %c0_6 = arith.constant 0 : index
    %c0_7 = arith.constant 0 : index
    %8 = vector.load %arg7[%c0_6, %c0_7] : memref<32x128xf32, #tpu.memory_space<vmem>>, vector<32x128xf32>
    tpu.vector_store %arg7[%c0_6, %c0_7], %7 {strides = array<i32>} : memref<32x128xf32, #tpu.memory_space<vmem>>, vector<32x128xf32>,
    %c0_i32_8 = arith.constant 0 : i32
    %9 = arith.cmpi eq, %arg2, %c0_i32_8 : i32
    %10 = arith.extui %9 : i1 to i32
    %c0_i32_9 = arith.constant 0 : i32
    %11 = arith.cmpi ne, %10, %c0_i32_9 : i32
    scf.if %11 {
      %c0_10 = arith.constant 0 : index
      %c0_11 = arith.constant 0 : index
      %12 = vector.load %arg7[%c0_10, %c0_11] : memref<32x128xf32, #tpu.memory_space<vmem>>, vector<32x128xf32>
      %c0_12 = arith.constant 0 : index
      %c0_13 = arith.constant 0 : index
      %13 = vector.load %arg5[%c0_12, %c0_13] : memref<1x128xf32, #tpu.memory_space<vmem>>, vector<1x128xf32>
      %14 = vector.broadcast %13 : vector<1x128xf32> to vector<32x128xf32>
      %15 = arith.addf %12, %14 : vector<32x128xf32>
      %cst_14 = arith.constant 0.000000e+00 : f32
      %16 = vector.broadcast %cst_14 : f32 to vector<32x128xf32>
      %17 = arith.maximumf %15, %16 : vector<32x128xf32>
      %18 = arith.truncf %17 : vector<32x128xf32> to vector<32x128xbf16>
      %c0_15 = arith.constant 0 : index
      %c0_16 = arith.constant 0 : index
      %19 = vector.load %arg6[%c0_15, %c0_16] : memref<32x128xbf16, #tpu.memory_space<vmem>>, vector<32x128xbf16>
      tpu.vector_store %arg6[%c0_15, %c0_16], %18 {strides = array<i32>} : memref<32x128xbf16, #tpu.memory_space<vmem>>, vector<32x128xbf16>,
    } else {
    }
    return
  }
  func.func @transform_0(%arg0: i32, %arg1: i32, %arg2: i32) -> (i32, i32) {
    %c0_i32 = arith.constant 0 : i32
    return %arg0, %arg2 : i32, i32
  }
  func.func @transform_1(%arg0: i32, %arg1: i32, %arg2: i32) -> (i32, i32) {
    %c0_i32 = arith.constant 0 : i32
    return %arg2, %arg1 : i32, i32
  }
  func.func @transform_2(%arg0: i32, %arg1: i32, %arg2: i32) -> (i32, i32) {
    %c0_i32 = arith.constant 0 : i32
    %c0_i32_0 = arith.constant 0 : i32
    return %c0_i32, %arg1 : i32, i32
  }
  func.func @transform_3(%arg0: i32, %arg1: i32, %arg2: i32) -> (i32, i32) {
    %c0_i32 = arith.constant 0 : i32
    return %arg0, %arg1 : i32, i32
  }
}

module attributes {stable_mosaic.version = 11 : i64} {
  func.func @_matmul_bias_act_kernel(%arg0: i32, %arg1: i32, %arg2: i32, %arg3: memref<8x640xbf16, #tpu.memory_space<vmem>>, %arg4: memref<640x128xbf16, #tpu.memory_space<vmem>>, %arg5: memref<1x128xf32, #tpu.memory_space<vmem>>, %arg6: memref<8x128xbf16, #tpu.memory_space<vmem>>, %arg7: memref<8x128xf32, #tpu.memory_space<vmem>>) attributes {dimension_semantics = [#tpu.dimension_semantics<parallel>, #tpu.dimension_semantics<parallel>, #tpu.dimension_semantics<arbitrary>], iteration_bounds = array<i64: 1, 1, 1>, scalar_prefetch = 0 : i64, scratch_operands = 1 : i64, tpu.core_type = #tpu.core_type<tc>, window_params = [{transform_indices = @transform_0, window_bounds = array<i64: 8, 640>}, {transform_indices = @transform_1, window_bounds = array<i64: 640, 128>}, {transform_indices = @transform_2, window_bounds = array<i64: 1, 128>}, {transform_indices = @transform_3, window_bounds = array<i64: 8, 128>}]} {
    %c0_i32 = arith.constant 0 : i32
    %0 = arith.cmpi eq, %arg2, %c0_i32 : i32
    %1 = arith.extui %0 : i1 to i32
    %c0_i32_0 = arith.constant 0 : i32
    %2 = arith.cmpi ne, %1, %c0_i32_0 : i32
    scf.if %2 {
      %cst_10 = arith.constant 0.000000e+00 : f32
      %12 = vector.broadcast %cst_10 : f32 to vector<8x128xf32>
      %c0_11 = arith.constant 0 : index
      %c0_12 = arith.constant 0 : index
      %13 = vector.load %arg7[%c0_11, %c0_12] : memref<8x128xf32, #tpu.memory_space<vmem>>, vector<8x128xf32>
      tpu.vector_store %arg7[%c0_11, %c0_12], %12 {strides = array<i32>} : memref<8x128xf32, #tpu.memory_space<vmem>>, vector<8x128xf32>,
    } else {
    }
    %c0 = arith.constant 0 : index
    %c0_1 = arith.constant 0 : index
    %3 = vector.load %arg7[%c0, %c0_1] : memref<8x128xf32, #tpu.memory_space<vmem>>, vector<8x128xf32>
    %c0_2 = arith.constant 0 : index
    %c0_3 = arith.constant 0 : index
    %4 = vector.load %arg3[%c0_2, %c0_3] : memref<8x640xbf16, #tpu.memory_space<vmem>>, vector<8x640xbf16>
    %c0_4 = arith.constant 0 : index
    %c0_5 = arith.constant 0 : index
    %5 = vector.load %arg4[%c0_4, %c0_5] : memref<640x128xbf16, #tpu.memory_space<vmem>>, vector<640x128xbf16>
    %cst = arith.constant dense<0.000000e+00> : vector<8x128xf32>
    %6 = tpu.matmul %4, %5, %cst {dimension_numbers = #tpu.dot_dimension_numbers<[1], [0], [0], [1], [0, 0, 1, 1], [], []>} : vector<8x640xbf16>, vector<640x128xbf16>, vector<8x128xf32> -> vector<8x128xf32>
    %7 = arith.addf %3, %6 : vector<8x128xf32>
    %c0_6 = arith.constant 0 : index
    %c0_7 = arith.constant 0 : index
    %8 = vector.load %arg7[%c0_6, %c0_7] : memref<8x128xf32, #tpu.memory_space<vmem>>, vector<8x128xf32>
    tpu.vector_store %arg7[%c0_6, %c0_7], %7 {strides = array<i32>} : memref<8x128xf32, #tpu.memory_space<vmem>>, vector<8x128xf32>,
    %c0_i32_8 = arith.constant 0 : i32
    %9 = arith.cmpi eq, %arg2, %c0_i32_8 : i32
    %10 = arith.extui %9 : i1 to i32
    %c0_i32_9 = arith.constant 0 : i32
    %11 = arith.cmpi ne, %10, %c0_i32_9 : i32
    scf.if %11 {
      %c0_10 = arith.constant 0 : index
      %c0_11 = arith.constant 0 : index
      %12 = vector.load %arg7[%c0_10, %c0_11] : memref<8x128xf32, #tpu.memory_space<vmem>>, vector<8x128xf32>
      %c0_12 = arith.constant 0 : index
      %c0_13 = arith.constant 0 : index
      %13 = vector.load %arg5[%c0_12, %c0_13] : memref<1x128xf32, #tpu.memory_space<vmem>>, vector<1x128xf32>
      %14 = vector.broadcast %13 : vector<1x128xf32> to vector<8x128xf32>
      %15 = arith.addf %12, %14 : vector<8x128xf32>
      %cst_14 = arith.constant 0.000000e+00 : f32
      %16 = vector.broadcast %cst_14 : f32 to vector<8x128xf32>
      %17 = arith.maximumf %15, %16 : vector<8x128xf32>
      %18 = arith.truncf %17 : vector<8x128xf32> to vector<8x128xbf16>
      %c0_15 = arith.constant 0 : index
      %c0_16 = arith.constant 0 : index
      %19 = vector.load %arg6[%c0_15, %c0_16] : memref<8x128xbf16, #tpu.memory_space<vmem>>, vector<8x128xbf16>
      tpu.vector_store %arg6[%c0_15, %c0_16], %18 {strides = array<i32>} : memref<8x128xbf16, #tpu.memory_space<vmem>>, vector<8x128xbf16>,
    } else {
    }
    return
  }
  func.func @transform_0(%arg0: i32, %arg1: i32, %arg2: i32) -> (i32, i32) {
    %c0_i32 = arith.constant 0 : i32
    return %arg0, %arg2 : i32, i32
  }
  func.func @transform_1(%arg0: i32, %arg1: i32, %arg2: i32) -> (i32, i32) {
    %c0_i32 = arith.constant 0 : i32
    return %arg2, %arg1 : i32, i32
  }
  func.func @transform_2(%arg0: i32, %arg1: i32, %arg2: i32) -> (i32, i32) {
    %c0_i32 = arith.constant 0 : i32
    %c0_i32_0 = arith.constant 0 : i32
    return %c0_i32, %arg1 : i32, i32
  }
  func.func @transform_3(%arg0: i32, %arg1: i32, %arg2: i32) -> (i32, i32) {
    %c0_i32 = arith.constant 0 : i32
    return %arg0, %arg1 : i32, i32
  }
}

module attributes {stable_mosaic.version = 11 : i64} {
  func.func @_matmul_bias_act_kernel(%arg0: i32, %arg1: i32, %arg2: i32, %arg3: memref<8x512xbf16, #tpu.memory_space<vmem>>, %arg4: memref<512x128xbf16, #tpu.memory_space<vmem>>, %arg5: memref<1x128xf32, #tpu.memory_space<vmem>>, %arg6: memref<8x128xf32, #tpu.memory_space<vmem>>, %arg7: memref<8x128xf32, #tpu.memory_space<vmem>>) attributes {dimension_semantics = [#tpu.dimension_semantics<parallel>, #tpu.dimension_semantics<parallel>, #tpu.dimension_semantics<arbitrary>], iteration_bounds = array<i64: 1, 1, 1>, scalar_prefetch = 0 : i64, scratch_operands = 1 : i64, tpu.core_type = #tpu.core_type<tc>, window_params = [{transform_indices = @transform_0, window_bounds = array<i64: 8, 512>}, {transform_indices = @transform_1, window_bounds = array<i64: 512, 128>}, {transform_indices = @transform_2, window_bounds = array<i64: 1, 128>}, {transform_indices = @transform_3, window_bounds = array<i64: 8, 128>}]} {
    %c0_i32 = arith.constant 0 : i32
    %0 = arith.cmpi eq, %arg2, %c0_i32 : i32
    %1 = arith.extui %0 : i1 to i32
    %c0_i32_0 = arith.constant 0 : i32
    %2 = arith.cmpi ne, %1, %c0_i32_0 : i32
    scf.if %2 {
      %cst_10 = arith.constant 0.000000e+00 : f32
      %12 = vector.broadcast %cst_10 : f32 to vector<8x128xf32>
      %c0_11 = arith.constant 0 : index
      %c0_12 = arith.constant 0 : index
      %13 = vector.load %arg7[%c0_11, %c0_12] : memref<8x128xf32, #tpu.memory_space<vmem>>, vector<8x128xf32>
      tpu.vector_store %arg7[%c0_11, %c0_12], %12 {strides = array<i32>} : memref<8x128xf32, #tpu.memory_space<vmem>>, vector<8x128xf32>,
    } else {
    }
    %c0 = arith.constant 0 : index
    %c0_1 = arith.constant 0 : index
    %3 = vector.load %arg7[%c0, %c0_1] : memref<8x128xf32, #tpu.memory_space<vmem>>, vector<8x128xf32>
    %c0_2 = arith.constant 0 : index
    %c0_3 = arith.constant 0 : index
    %4 = vector.load %arg3[%c0_2, %c0_3] : memref<8x512xbf16, #tpu.memory_space<vmem>>, vector<8x512xbf16>
    %c0_4 = arith.constant 0 : index
    %c0_5 = arith.constant 0 : index
    %5 = vector.load %arg4[%c0_4, %c0_5] : memref<512x128xbf16, #tpu.memory_space<vmem>>, vector<512x128xbf16>
    %cst = arith.constant dense<0.000000e+00> : vector<8x128xf32>
    %6 = tpu.matmul %4, %5, %cst {dimension_numbers = #tpu.dot_dimension_numbers<[1], [0], [0], [1], [0, 0, 1, 1], [], []>} : vector<8x512xbf16>, vector<512x128xbf16>, vector<8x128xf32> -> vector<8x128xf32>
    %7 = arith.addf %3, %6 : vector<8x128xf32>
    %c0_6 = arith.constant 0 : index
    %c0_7 = arith.constant 0 : index
    %8 = vector.load %arg7[%c0_6, %c0_7] : memref<8x128xf32, #tpu.memory_space<vmem>>, vector<8x128xf32>
    tpu.vector_store %arg7[%c0_6, %c0_7], %7 {strides = array<i32>} : memref<8x128xf32, #tpu.memory_space<vmem>>, vector<8x128xf32>,
    %c0_i32_8 = arith.constant 0 : i32
    %9 = arith.cmpi eq, %arg2, %c0_i32_8 : i32
    %10 = arith.extui %9 : i1 to i32
    %c0_i32_9 = arith.constant 0 : i32
    %11 = arith.cmpi ne, %10, %c0_i32_9 : i32
    scf.if %11 {
      %c0_10 = arith.constant 0 : index
      %c0_11 = arith.constant 0 : index
      %12 = vector.load %arg7[%c0_10, %c0_11] : memref<8x128xf32, #tpu.memory_space<vmem>>, vector<8x128xf32>
      %c0_12 = arith.constant 0 : index
      %c0_13 = arith.constant 0 : index
      %13 = vector.load %arg5[%c0_12, %c0_13] : memref<1x128xf32, #tpu.memory_space<vmem>>, vector<1x128xf32>
      %14 = vector.broadcast %13 : vector<1x128xf32> to vector<8x128xf32>
      %15 = arith.addf %12, %14 : vector<8x128xf32>
      %c0_14 = arith.constant 0 : index
      %c0_15 = arith.constant 0 : index
      %16 = vector.load %arg6[%c0_14, %c0_15] : memref<8x128xf32, #tpu.memory_space<vmem>>, vector<8x128xf32>
      tpu.vector_store %arg6[%c0_14, %c0_15], %15 {strides = array<i32>} : memref<8x128xf32, #tpu.memory_space<vmem>>, vector<8x128xf32>,
    } else {
    }
    return
  }
  func.func @transform_0(%arg0: i32, %arg1: i32, %arg2: i32) -> (i32, i32) {
    %c0_i32 = arith.constant 0 : i32
    return %arg0, %arg2 : i32, i32
  }
  func.func @transform_1(%arg0: i32, %arg1: i32, %arg2: i32) -> (i32, i32) {
    %c0_i32 = arith.constant 0 : i32
    return %arg2, %arg1 : i32, i32
  }
  func.func @transform_2(%arg0: i32, %arg1: i32, %arg2: i32) -> (i32, i32) {
    %c0_i32 = arith.constant 0 : i32
    %c0_i32_0 = arith.constant 0 : i32
    return %c0_i32, %arg1 : i32, i32
  }
  func.func @transform_3(%arg0: i32, %arg1: i32, %arg2: i32) -> (i32, i32) {
    %c0_i32 = arith.constant 0 : i32
    return %arg0, %arg1 : i32, i32
  }
}

module attributes {stable_mosaic.version = 11 : i64} {
  func.func @_fc_dec_reparam_kernel(%arg0: i32, %arg1: i32, %arg2: memref<8x128xf32, #tpu.memory_space<vmem>>, %arg3: memref<8x128xf32, #tpu.memory_space<vmem>>, %arg4: memref<8x128xf32, #tpu.memory_space<vmem>>, %arg5: memref<128x256xbf16, #tpu.memory_space<vmem>>, %arg6: memref<1x256xf32, #tpu.memory_space<vmem>>, %arg7: memref<8x256xbf16, #tpu.memory_space<vmem>>) attributes {dimension_semantics = [#tpu.dimension_semantics<parallel>, #tpu.dimension_semantics<parallel>], iteration_bounds = array<i64: 1, 2>, scalar_prefetch = 0 : i64, scratch_operands = 0 : i64, tpu.core_type = #tpu.core_type<tc>, window_params = [{transform_indices = @transform_0, window_bounds = array<i64: 8, 128>}, {transform_indices = @transform_1, window_bounds = array<i64: 8, 128>}, {transform_indices = @transform_2, window_bounds = array<i64: 8, 128>}, {transform_indices = @transform_3, window_bounds = array<i64: 128, 256>}, {transform_indices = @transform_4, window_bounds = array<i64: 1, 256>}, {transform_indices = @transform_5, window_bounds = array<i64: 8, 256>}]} {
    %c0 = arith.constant 0 : index
    %c0_0 = arith.constant 0 : index
    %0 = vector.load %arg2[%c0, %c0_0] : memref<8x128xf32, #tpu.memory_space<vmem>>, vector<8x128xf32>
    %c0_1 = arith.constant 0 : index
    %c0_2 = arith.constant 0 : index
    %1 = vector.load %arg4[%c0_1, %c0_2] : memref<8x128xf32, #tpu.memory_space<vmem>>, vector<8x128xf32>
    %c0_3 = arith.constant 0 : index
    %c0_4 = arith.constant 0 : index
    %2 = vector.load %arg3[%c0_3, %c0_4] : memref<8x128xf32, #tpu.memory_space<vmem>>, vector<8x128xf32>
    %cst = arith.constant 5.000000e-01 : f32
    %3 = vector.broadcast %cst : f32 to vector<8x128xf32>
    %4 = arith.mulf %3, %2 : vector<8x128xf32>
    %5 = math.exp %4 : vector<8x128xf32>
    %6 = arith.mulf %1, %5 : vector<8x128xf32>
    %7 = arith.addf %0, %6 : vector<8x128xf32>
    %8 = arith.truncf %7 : vector<8x128xf32> to vector<8x128xbf16>
    %c0_5 = arith.constant 0 : index
    %c0_6 = arith.constant 0 : index
    %9 = vector.load %arg5[%c0_5, %c0_6] : memref<128x256xbf16, #tpu.memory_space<vmem>>, vector<128x256xbf16>
    %cst_7 = arith.constant dense<0.000000e+00> : vector<8x256xf32>
    %10 = tpu.matmul %8, %9, %cst_7 {dimension_numbers = #tpu.dot_dimension_numbers<[1], [0], [0], [1], [0, 0, 1, 1], [], []>} : vector<8x128xbf16>, vector<128x256xbf16>, vector<8x256xf32> -> vector<8x256xf32>
    %c0_8 = arith.constant 0 : index
    %c0_9 = arith.constant 0 : index
    %11 = vector.load %arg6[%c0_8, %c0_9] : memref<1x256xf32, #tpu.memory_space<vmem>>, vector<1x256xf32>
    %12 = vector.broadcast %11 : vector<1x256xf32> to vector<8x256xf32>
    %13 = arith.addf %10, %12 : vector<8x256xf32>
    %14 = arith.truncf %13 : vector<8x256xf32> to vector<8x256xbf16>
    %c0_10 = arith.constant 0 : index
    %c0_11 = arith.constant 0 : index
    %15 = vector.load %arg7[%c0_10, %c0_11] : memref<8x256xbf16, #tpu.memory_space<vmem>>, vector<8x256xbf16>
    tpu.vector_store %arg7[%c0_10, %c0_11], %14 {strides = array<i32>} : memref<8x256xbf16, #tpu.memory_space<vmem>>, vector<8x256xbf16>,
    return
  }
  func.func @transform_0(%arg0: i32, %arg1: i32) -> (i32, i32) {
    %c0_i32 = arith.constant 0 : i32
    %c0_i32_0 = arith.constant 0 : i32
    return %arg0, %c0_i32 : i32, i32
  }
  func.func @transform_1(%arg0: i32, %arg1: i32) -> (i32, i32) {
    %c0_i32 = arith.constant 0 : i32
    %c0_i32_0 = arith.constant 0 : i32
    return %arg0, %c0_i32 : i32, i32
  }
  func.func @transform_2(%arg0: i32, %arg1: i32) -> (i32, i32) {
    %c0_i32 = arith.constant 0 : i32
    %c0_i32_0 = arith.constant 0 : i32
    return %arg0, %c0_i32 : i32, i32
  }
  func.func @transform_3(%arg0: i32, %arg1: i32) -> (i32, i32) {
    %c0_i32 = arith.constant 0 : i32
    %c0_i32_0 = arith.constant 0 : i32
    return %c0_i32, %arg1 : i32, i32
  }
  func.func @transform_4(%arg0: i32, %arg1: i32) -> (i32, i32) {
    %c0_i32 = arith.constant 0 : i32
    %c0_i32_0 = arith.constant 0 : i32
    return %c0_i32, %arg1 : i32, i32
  }
  func.func @transform_5(%arg0: i32, %arg1: i32) -> (i32, i32) {
    %c0_i32 = arith.constant 0 : i32
    return %arg0, %arg1 : i32, i32
  }
}

module attributes {stable_mosaic.version = 11 : i64} {
  func.func @_matmul_bias_act_kernel(%arg0: i32, %arg1: i32, %arg2: i32, %arg3: memref<8x512xbf16, #tpu.memory_space<vmem>>, %arg4: memref<512x256xbf16, #tpu.memory_space<vmem>>, %arg5: memref<1x256xf32, #tpu.memory_space<vmem>>, %arg6: memref<8x256xbf16, #tpu.memory_space<vmem>>, %arg7: memref<8x256xf32, #tpu.memory_space<vmem>>) attributes {dimension_semantics = [#tpu.dimension_semantics<parallel>, #tpu.dimension_semantics<parallel>, #tpu.dimension_semantics<arbitrary>], iteration_bounds = array<i64: 1, 1, 1>, scalar_prefetch = 0 : i64, scratch_operands = 1 : i64, tpu.core_type = #tpu.core_type<tc>, window_params = [{transform_indices = @transform_0, window_bounds = array<i64: 8, 512>}, {transform_indices = @transform_1, window_bounds = array<i64: 512, 256>}, {transform_indices = @transform_2, window_bounds = array<i64: 1, 256>}, {transform_indices = @transform_3, window_bounds = array<i64: 8, 256>}]} {
    %c0_i32 = arith.constant 0 : i32
    %0 = arith.cmpi eq, %arg2, %c0_i32 : i32
    %1 = arith.extui %0 : i1 to i32
    %c0_i32_0 = arith.constant 0 : i32
    %2 = arith.cmpi ne, %1, %c0_i32_0 : i32
    scf.if %2 {
      %cst_10 = arith.constant 0.000000e+00 : f32
      %12 = vector.broadcast %cst_10 : f32 to vector<8x256xf32>
      %c0_11 = arith.constant 0 : index
      %c0_12 = arith.constant 0 : index
      %13 = vector.load %arg7[%c0_11, %c0_12] : memref<8x256xf32, #tpu.memory_space<vmem>>, vector<8x256xf32>
      tpu.vector_store %arg7[%c0_11, %c0_12], %12 {strides = array<i32>} : memref<8x256xf32, #tpu.memory_space<vmem>>, vector<8x256xf32>,
    } else {
    }
    %c0 = arith.constant 0 : index
    %c0_1 = arith.constant 0 : index
    %3 = vector.load %arg7[%c0, %c0_1] : memref<8x256xf32, #tpu.memory_space<vmem>>, vector<8x256xf32>
    %c0_2 = arith.constant 0 : index
    %c0_3 = arith.constant 0 : index
    %4 = vector.load %arg3[%c0_2, %c0_3] : memref<8x512xbf16, #tpu.memory_space<vmem>>, vector<8x512xbf16>
    %c0_4 = arith.constant 0 : index
    %c0_5 = arith.constant 0 : index
    %5 = vector.load %arg4[%c0_4, %c0_5] : memref<512x256xbf16, #tpu.memory_space<vmem>>, vector<512x256xbf16>
    %cst = arith.constant dense<0.000000e+00> : vector<8x256xf32>
    %6 = tpu.matmul %4, %5, %cst {dimension_numbers = #tpu.dot_dimension_numbers<[1], [0], [0], [1], [0, 0, 1, 1], [], []>} : vector<8x512xbf16>, vector<512x256xbf16>, vector<8x256xf32> -> vector<8x256xf32>
    %7 = arith.addf %3, %6 : vector<8x256xf32>
    %c0_6 = arith.constant 0 : index
    %c0_7 = arith.constant 0 : index
    %8 = vector.load %arg7[%c0_6, %c0_7] : memref<8x256xf32, #tpu.memory_space<vmem>>, vector<8x256xf32>
    tpu.vector_store %arg7[%c0_6, %c0_7], %7 {strides = array<i32>} : memref<8x256xf32, #tpu.memory_space<vmem>>, vector<8x256xf32>,
    %c0_i32_8 = arith.constant 0 : i32
    %9 = arith.cmpi eq, %arg2, %c0_i32_8 : i32
    %10 = arith.extui %9 : i1 to i32
    %c0_i32_9 = arith.constant 0 : i32
    %11 = arith.cmpi ne, %10, %c0_i32_9 : i32
    scf.if %11 {
      %c0_10 = arith.constant 0 : index
      %c0_11 = arith.constant 0 : index
      %12 = vector.load %arg7[%c0_10, %c0_11] : memref<8x256xf32, #tpu.memory_space<vmem>>, vector<8x256xf32>
      %c0_12 = arith.constant 0 : index
      %c0_13 = arith.constant 0 : index
      %13 = vector.load %arg5[%c0_12, %c0_13] : memref<1x256xf32, #tpu.memory_space<vmem>>, vector<1x256xf32>
      %14 = vector.broadcast %13 : vector<1x256xf32> to vector<8x256xf32>
      %15 = arith.addf %12, %14 : vector<8x256xf32>
      %cst_14 = arith.constant 0.000000e+00 : f32
      %16 = vector.broadcast %cst_14 : f32 to vector<8x256xf32>
      %17 = arith.maximumf %15, %16 : vector<8x256xf32>
      %18 = arith.truncf %17 : vector<8x256xf32> to vector<8x256xbf16>
      %c0_15 = arith.constant 0 : index
      %c0_16 = arith.constant 0 : index
      %19 = vector.load %arg6[%c0_15, %c0_16] : memref<8x256xbf16, #tpu.memory_space<vmem>>, vector<8x256xbf16>
      tpu.vector_store %arg6[%c0_15, %c0_16], %18 {strides = array<i32>} : memref<8x256xbf16, #tpu.memory_space<vmem>>, vector<8x256xbf16>,
    } else {
    }
    return
  }
  func.func @transform_0(%arg0: i32, %arg1: i32, %arg2: i32) -> (i32, i32) {
    %c0_i32 = arith.constant 0 : i32
    return %arg0, %arg2 : i32, i32
  }
  func.func @transform_1(%arg0: i32, %arg1: i32, %arg2: i32) -> (i32, i32) {
    %c0_i32 = arith.constant 0 : i32
    return %arg2, %arg1 : i32, i32
  }
  func.func @transform_2(%arg0: i32, %arg1: i32, %arg2: i32) -> (i32, i32) {
    %c0_i32 = arith.constant 0 : i32
    %c0_i32_0 = arith.constant 0 : i32
    return %c0_i32, %arg1 : i32, i32
  }
  func.func @transform_3(%arg0: i32, %arg1: i32, %arg2: i32) -> (i32, i32) {
    %c0_i32 = arith.constant 0 : i32
    return %arg0, %arg1 : i32, i32
  }
}

module attributes {stable_mosaic.version = 11 : i64} {
  func.func @_matmul_bias_act_kernel(%arg0: i32, %arg1: i32, %arg2: i32, %arg3: memref<32x256xbf16, #tpu.memory_space<vmem>>, %arg4: memref<256x128xbf16, #tpu.memory_space<vmem>>, %arg5: memref<1x128xf32, #tpu.memory_space<vmem>>, %arg6: memref<32x128xbf16, #tpu.memory_space<vmem>>, %arg7: memref<32x128xf32, #tpu.memory_space<vmem>>) attributes {dimension_semantics = [#tpu.dimension_semantics<parallel>, #tpu.dimension_semantics<parallel>, #tpu.dimension_semantics<arbitrary>], iteration_bounds = array<i64: 1, 1, 1>, scalar_prefetch = 0 : i64, scratch_operands = 1 : i64, tpu.core_type = #tpu.core_type<tc>, window_params = [{transform_indices = @transform_0, window_bounds = array<i64: 32, 256>}, {transform_indices = @transform_1, window_bounds = array<i64: 256, 128>}, {transform_indices = @transform_2, window_bounds = array<i64: 1, 128>}, {transform_indices = @transform_3, window_bounds = array<i64: 32, 128>}]} {
    %c0_i32 = arith.constant 0 : i32
    %0 = arith.cmpi eq, %arg2, %c0_i32 : i32
    %1 = arith.extui %0 : i1 to i32
    %c0_i32_0 = arith.constant 0 : i32
    %2 = arith.cmpi ne, %1, %c0_i32_0 : i32
    scf.if %2 {
      %cst_10 = arith.constant 0.000000e+00 : f32
      %12 = vector.broadcast %cst_10 : f32 to vector<32x128xf32>
      %c0_11 = arith.constant 0 : index
      %c0_12 = arith.constant 0 : index
      %13 = vector.load %arg7[%c0_11, %c0_12] : memref<32x128xf32, #tpu.memory_space<vmem>>, vector<32x128xf32>
      tpu.vector_store %arg7[%c0_11, %c0_12], %12 {strides = array<i32>} : memref<32x128xf32, #tpu.memory_space<vmem>>, vector<32x128xf32>,
    } else {
    }
    %c0 = arith.constant 0 : index
    %c0_1 = arith.constant 0 : index
    %3 = vector.load %arg7[%c0, %c0_1] : memref<32x128xf32, #tpu.memory_space<vmem>>, vector<32x128xf32>
    %c0_2 = arith.constant 0 : index
    %c0_3 = arith.constant 0 : index
    %4 = vector.load %arg3[%c0_2, %c0_3] : memref<32x256xbf16, #tpu.memory_space<vmem>>, vector<32x256xbf16>
    %c0_4 = arith.constant 0 : index
    %c0_5 = arith.constant 0 : index
    %5 = vector.load %arg4[%c0_4, %c0_5] : memref<256x128xbf16, #tpu.memory_space<vmem>>, vector<256x128xbf16>
    %cst = arith.constant dense<0.000000e+00> : vector<32x128xf32>
    %6 = tpu.matmul %4, %5, %cst {dimension_numbers = #tpu.dot_dimension_numbers<[1], [0], [0], [1], [0, 0, 1, 1], [], []>} : vector<32x256xbf16>, vector<256x128xbf16>, vector<32x128xf32> -> vector<32x128xf32>
    %7 = arith.addf %3, %6 : vector<32x128xf32>
    %c0_6 = arith.constant 0 : index
    %c0_7 = arith.constant 0 : index
    %8 = vector.load %arg7[%c0_6, %c0_7] : memref<32x128xf32, #tpu.memory_space<vmem>>, vector<32x128xf32>
    tpu.vector_store %arg7[%c0_6, %c0_7], %7 {strides = array<i32>} : memref<32x128xf32, #tpu.memory_space<vmem>>, vector<32x128xf32>,
    %c0_i32_8 = arith.constant 0 : i32
    %9 = arith.cmpi eq, %arg2, %c0_i32_8 : i32
    %10 = arith.extui %9 : i1 to i32
    %c0_i32_9 = arith.constant 0 : i32
    %11 = arith.cmpi ne, %10, %c0_i32_9 : i32
    scf.if %11 {
      %c0_10 = arith.constant 0 : index
      %c0_11 = arith.constant 0 : index
      %12 = vector.load %arg7[%c0_10, %c0_11] : memref<32x128xf32, #tpu.memory_space<vmem>>, vector<32x128xf32>
      %c0_12 = arith.constant 0 : index
      %c0_13 = arith.constant 0 : index
      %13 = vector.load %arg5[%c0_12, %c0_13] : memref<1x128xf32, #tpu.memory_space<vmem>>, vector<1x128xf32>
      %14 = vector.broadcast %13 : vector<1x128xf32> to vector<32x128xf32>
      %15 = arith.addf %12, %14 : vector<32x128xf32>
      %cst_14 = arith.constant 0.000000e+00 : f32
      %16 = vector.broadcast %cst_14 : f32 to vector<32x128xf32>
      %17 = arith.maximumf %15, %16 : vector<32x128xf32>
      %18 = arith.truncf %17 : vector<32x128xf32> to vector<32x128xbf16>
      %c0_15 = arith.constant 0 : index
      %c0_16 = arith.constant 0 : index
      %19 = vector.load %arg6[%c0_15, %c0_16] : memref<32x128xbf16, #tpu.memory_space<vmem>>, vector<32x128xbf16>
      tpu.vector_store %arg6[%c0_15, %c0_16], %18 {strides = array<i32>} : memref<32x128xbf16, #tpu.memory_space<vmem>>, vector<32x128xbf16>,
    } else {
    }
    return
  }
  func.func @transform_0(%arg0: i32, %arg1: i32, %arg2: i32) -> (i32, i32) {
    %c0_i32 = arith.constant 0 : i32
    return %arg0, %arg2 : i32, i32
  }
  func.func @transform_1(%arg0: i32, %arg1: i32, %arg2: i32) -> (i32, i32) {
    %c0_i32 = arith.constant 0 : i32
    return %arg2, %arg1 : i32, i32
  }
  func.func @transform_2(%arg0: i32, %arg1: i32, %arg2: i32) -> (i32, i32) {
    %c0_i32 = arith.constant 0 : i32
    %c0_i32_0 = arith.constant 0 : i32
    return %c0_i32, %arg1 : i32, i32
  }
  func.func @transform_3(%arg0: i32, %arg1: i32, %arg2: i32) -> (i32, i32) {
    %c0_i32 = arith.constant 0 : i32
    return %arg0, %arg1 : i32, i32
  }
}

module attributes {stable_mosaic.version = 11 : i64} {
  func.func @_matmul_bias_act_kernel(%arg0: i32, %arg1: i32, %arg2: i32, %arg3: memref<128x128xbf16, #tpu.memory_space<vmem>>, %arg4: memref<128x128xbf16, #tpu.memory_space<vmem>>, %arg5: memref<1x128xf32, #tpu.memory_space<vmem>>, %arg6: memref<128x128xf32, #tpu.memory_space<vmem>>, %arg7: memref<128x128xf32, #tpu.memory_space<vmem>>) attributes {dimension_semantics = [#tpu.dimension_semantics<parallel>, #tpu.dimension_semantics<parallel>, #tpu.dimension_semantics<arbitrary>], iteration_bounds = array<i64: 1, 1, 1>, scalar_prefetch = 0 : i64, scratch_operands = 1 : i64, tpu.core_type = #tpu.core_type<tc>, window_params = [{transform_indices = @transform_0, window_bounds = array<i64: 128, 128>}, {transform_indices = @transform_1, window_bounds = array<i64: 128, 128>}, {transform_indices = @transform_2, window_bounds = array<i64: 1, 128>}, {transform_indices = @transform_3, window_bounds = array<i64: 128, 128>}]} {
    %c0_i32 = arith.constant 0 : i32
    %0 = arith.cmpi eq, %arg2, %c0_i32 : i32
    %1 = arith.extui %0 : i1 to i32
    %c0_i32_0 = arith.constant 0 : i32
    %2 = arith.cmpi ne, %1, %c0_i32_0 : i32
    scf.if %2 {
      %cst_10 = arith.constant 0.000000e+00 : f32
      %12 = vector.broadcast %cst_10 : f32 to vector<128x128xf32>
      %c0_11 = arith.constant 0 : index
      %c0_12 = arith.constant 0 : index
      %13 = vector.load %arg7[%c0_11, %c0_12] : memref<128x128xf32, #tpu.memory_space<vmem>>, vector<128x128xf32>
      tpu.vector_store %arg7[%c0_11, %c0_12], %12 {strides = array<i32>} : memref<128x128xf32, #tpu.memory_space<vmem>>, vector<128x128xf32>,
    } else {
    }
    %c0 = arith.constant 0 : index
    %c0_1 = arith.constant 0 : index
    %3 = vector.load %arg7[%c0, %c0_1] : memref<128x128xf32, #tpu.memory_space<vmem>>, vector<128x128xf32>
    %c0_2 = arith.constant 0 : index
    %c0_3 = arith.constant 0 : index
    %4 = vector.load %arg3[%c0_2, %c0_3] : memref<128x128xbf16, #tpu.memory_space<vmem>>, vector<128x128xbf16>
    %c0_4 = arith.constant 0 : index
    %c0_5 = arith.constant 0 : index
    %5 = vector.load %arg4[%c0_4, %c0_5] : memref<128x128xbf16, #tpu.memory_space<vmem>>, vector<128x128xbf16>
    %cst = arith.constant dense<0.000000e+00> : vector<128x128xf32>
    %6 = tpu.matmul %4, %5, %cst {dimension_numbers = #tpu.dot_dimension_numbers<[1], [0], [0], [1], [0, 0, 1, 1], [], []>} : vector<128x128xbf16>, vector<128x128xbf16>, vector<128x128xf32> -> vector<128x128xf32>
    %7 = arith.addf %3, %6 : vector<128x128xf32>
    %c0_6 = arith.constant 0 : index
    %c0_7 = arith.constant 0 : index
    %8 = vector.load %arg7[%c0_6, %c0_7] : memref<128x128xf32, #tpu.memory_space<vmem>>, vector<128x128xf32>
    tpu.vector_store %arg7[%c0_6, %c0_7], %7 {strides = array<i32>} : memref<128x128xf32, #tpu.memory_space<vmem>>, vector<128x128xf32>,
    %c0_i32_8 = arith.constant 0 : i32
    %9 = arith.cmpi eq, %arg2, %c0_i32_8 : i32
    %10 = arith.extui %9 : i1 to i32
    %c0_i32_9 = arith.constant 0 : i32
    %11 = arith.cmpi ne, %10, %c0_i32_9 : i32
    scf.if %11 {
      %c0_10 = arith.constant 0 : index
      %c0_11 = arith.constant 0 : index
      %12 = vector.load %arg7[%c0_10, %c0_11] : memref<128x128xf32, #tpu.memory_space<vmem>>, vector<128x128xf32>
      %c0_12 = arith.constant 0 : index
      %c0_13 = arith.constant 0 : index
      %13 = vector.load %arg5[%c0_12, %c0_13] : memref<1x128xf32, #tpu.memory_space<vmem>>, vector<1x128xf32>
      %14 = vector.broadcast %13 : vector<1x128xf32> to vector<128x128xf32>
      %15 = arith.addf %12, %14 : vector<128x128xf32>
      %16 = arith.negf %15 : vector<128x128xf32>
      %17 = math.exp %16 : vector<128x128xf32>
      %cst_14 = arith.constant 1.000000e+00 : f32
      %18 = vector.broadcast %cst_14 : f32 to vector<128x128xf32>
      %19 = arith.addf %18, %17 : vector<128x128xf32>
      %20 = arith.divf %18, %19 : vector<128x128xf32>
      %c0_15 = arith.constant 0 : index
      %c0_16 = arith.constant 0 : index
      %21 = vector.load %arg6[%c0_15, %c0_16] : memref<128x128xf32, #tpu.memory_space<vmem>>, vector<128x128xf32>
      tpu.vector_store %arg6[%c0_15, %c0_16], %20 {strides = array<i32>} : memref<128x128xf32, #tpu.memory_space<vmem>>, vector<128x128xf32>,
    } else {
    }
    return
  }
  func.func @transform_0(%arg0: i32, %arg1: i32, %arg2: i32) -> (i32, i32) {
    %c0_i32 = arith.constant 0 : i32
    return %arg0, %arg2 : i32, i32
  }
  func.func @transform_1(%arg0: i32, %arg1: i32, %arg2: i32) -> (i32, i32) {
    %c0_i32 = arith.constant 0 : i32
    return %arg2, %arg1 : i32, i32
  }
  func.func @transform_2(%arg0: i32, %arg1: i32, %arg2: i32) -> (i32, i32) {
    %c0_i32 = arith.constant 0 : i32
    %c0_i32_0 = arith.constant 0 : i32
    return %c0_i32, %arg1 : i32, i32
  }
  func.func @transform_3(%arg0: i32, %arg1: i32, %arg2: i32) -> (i32, i32) {
    %c0_i32 = arith.constant 0 : i32
    return %arg0, %arg1 : i32, i32
  }
}

</mosaic_0001>

<bundles_post_ra>
// kernel: spectrogram_vae_forward.8
= control target key start
LH: loop header
LB: loop body
LE: loop exit
PB: predicated region body
PF: predicated region fallthrough
CT: control target
= control target key end

     0   :  { %s721_s1 = inlined_call_operand.vmem [shape: bf16[128,128], index: 1, kind: input, shape index: {}]   ;;  %s722_s0 = inlined_call_operand.vmem [shape: bf16[128,128], index: 0, kind: input, shape index: {}]   ;;  %s723_s2 = inlined_call_operand.vmem [shape: f32[1,128], index: 2, kind: input, shape index: {}]   ;;  %s724_s3 = inlined_call_operand.vmem [shape: bf16[128,128], index: 3, kind: output, shape index: {}]  }
   0x1   :  { %v610_v0 = vld [vmem:[%s721_s1 + $0x38] sm:$0xff]   ;;  %v611_v1 = vld [vmem:[%s721_s1 + $0x30] sm:$0xff]   ;;  %v612_v2 = vld [vmem:[%s721_s1 + $0x28] sm:$0xff]  }
   0x2   :  { %562 = vmatprep.subr.bf16.mxu0 %v610_v0  ;;  %594 = vmatprep.subr.bf16.mxu1 %v610_v0  ;;  %v613_v3 = vld [vmem:[%s721_s1 + $0x20] sm:$0xff]   ;;  %v614_v6 = vld [vmem:[%s721_s1 + $0x18] sm:$0xff]   ;;  %v615_v7 = vld [vmem:[%s721_s1 + $0x10] sm:$0xff]  }
   0x3   :  { %563 = vmatpush3.bf16.msra.mxu0 %v610_v0  ;;  %602 = vmatpush3.bf16.msra.mxu1 %v610_v0  ;;  %v618_v4 = vld [vmem:[%s722_s0] sm:$0xff]   ;;  %v616_v8 = vld [vmem:[%s721_s1 + $0x8] sm:$0xff]   ;;  %v622_v12 = vld [vmem:[%s722_s0 + $0x10] sm:$0xff]  }
   0x4   :  { %564 = vmatprep.subr.bf16.mxu0 %v611_v1  ;;  %595 = vmatprep.subr.bf16.mxu1 %v611_v1  ;;  %v619_v5 = vld [vmem:[%s722_s0 + $0x20] sm:$0xff]   ;;  %v620_v10 = vld [vmem:[%s722_s0 + $0x8] sm:$0xff]   ;;  %v623_v13 = vld [vmem:[%s722_s0 + $0x30] sm:$0xff]  }
   0x5   :  { %578 = vmatprep.mubr.bf16.mxu0 %v618_v4  ;;  %586 = vmatprep.mubr.bf16.mxu1 %v619_v5  ;;  %v617_v9 = vld [vmem:[%s721_s1] sm:$0xff]   ;;  %v621_v11 = vld [vmem:[%s722_s0 + $0x28] sm:$0xff]   ;;  %v624_v14 = vld [vmem:[%s722_s0 + $0x18] sm:$0xff]  }
   0x6   :  { %v625_v15 = vld [vmem:[%s722_s0 + $0x38] sm:$0xff]   ;;  %v466_v16 = vld [vmem:[%s723_s2] ss:$0 sm:$0xff] }
   0x7   :  { %565 = vmatpush3.bf16.msra.mxu0 %v611_v1  ;;  %603 = vmatpush3.bf16.msra.mxu1 %v611_v1 }
   0x8   :  { %566 = vmatprep.subr.bf16.mxu0 %v612_v2  ;;  %596 = vmatprep.subr.bf16.mxu1 %v612_v2 }
   0xb   :  { %567 = vmatpush3.bf16.msra.mxu0 %v612_v2  ;;  %604 = vmatpush3.bf16.msra.mxu1 %v612_v2 }
   0xc   :  { %568 = vmatprep.subr.bf16.mxu0 %v613_v3  ;;  %597 = vmatprep.subr.bf16.mxu1 %v613_v3 }
   0xf   :  { %569 = vmatpush3.bf16.msra.mxu0 %v613_v3  ;;  %605 = vmatpush3.bf16.msra.mxu1 %v613_v3 }
  0x10   :  { %570 = vmatprep.subr.bf16.mxu0 %v614_v6  ;;  %598 = vmatprep.subr.bf16.mxu1 %v614_v6 }
  0x13   :  { %571 = vmatpush3.bf16.msra.mxu0 %v614_v6  ;;  %606 = vmatpush3.bf16.msra.mxu1 %v614_v6 }
  0x14   :  { %572 = vmatprep.subr.bf16.mxu0 %v615_v7  ;;  %599 = vmatprep.subr.bf16.mxu1 %v615_v7 }
  0x17   :  { %573 = vmatpush3.bf16.msra.mxu0 %v615_v7  ;;  %607 = vmatpush3.bf16.msra.mxu1 %v615_v7 }
  0x18   :  { %574 = vmatprep.subr.bf16.mxu0 %v616_v8  ;;  %600 = vmatprep.subr.bf16.mxu1 %v616_v8 }
  0x1b   :  { %575 = vmatpush3.bf16.msra.mxu0 %v616_v8  ;;  %608 = vmatpush3.bf16.msra.mxu1 %v616_v8 }
  0x1c   :  { %576 = vmatprep.subr.bf16.mxu0 %v617_v9  ;;  %601 = vmatprep.subr.bf16.mxu1 %v617_v9 }
  0x1f   :  { %577 = vmatpush3.bf16.msra.mxu0 %v617_v9  ;;  %609 = vmatpush3.bf16.msra.mxu1 %v617_v9 }
  0x22   :  { %579 = vmatmul.mubr.bf16.vlgmr.msra.gmra.mxu0 %v620_v10  ;;  %587 = vmatmul.mubr.bf16.vlgmr.msra.gmra.mxu1 %v621_v11 }
  0x23   :  { %582 = vmatprep.mubr.bf16.mxu0 %v622_v12  ;;  %590 = vmatprep.mubr.bf16.mxu1 %v623_v13 }
  0x2a   :  { %583 = vmatmul.mubr.bf16.gmra.mxu0 %v624_v14  ;;  %591 = vmatmul.mubr.bf16.gmra.mxu1 %v625_v15 }
  0xe2   :  { %v580_v17 = vpop.f32.mrf.mxu0  ;;  %v588_v18 = vpop.f32.mrf.mxu1 }
  0xe3   :  { %v336_v19 = vadd.f32 %v580_v17, %v466_v16  ;;  %v344_v20 = vadd.f32 %v588_v18, %v466_v16 }
  0xe4   :  { %v213_v21 = vpop.f32.mrf.mxu0  ;;  %v245_v22 = vpop.f32.mrf.mxu1 }
  0xe5   :  { %v334_v23 = vadd.f32 %v466_v16, %v213_v21  ;;  %v342_v24 = vadd.f32 %v466_v16, %v245_v22  ;;  %v352_v29 = vmax.f32 %v336_v19, 0.0  ;;  %v360_v30 = vmax.f32 %v344_v20, 0.0 }
  0xe6   :  { %v581_v25 = vpop.f32.mrf.mxu0  ;;  %v589_v26 = vpop.f32.mrf.mxu1 }
  0xe7   :  { %v337_v27 = vadd.f32 %v581_v25, %v466_v16  ;;  %v345_v28 = vadd.f32 %v589_v26, %v466_v16  ;;  %v350_v37 = vmax.f32 %v334_v23, 0.0  ;;  %v358_v38 = vmax.f32 %v342_v24, 0.0 }
  0xe8   :  { %v216_v31 = vpop.f32.mrf.mxu0  ;;  %v248_v32 = vpop.f32.mrf.mxu1 }
  0xe9   :  { %v353_v33 = vmax.f32 %v337_v27, 0.0  ;;  %v361_v34 = vmax.f32 %v345_v28, 0.0  ;;  %v335_v35 = vadd.f32 %v466_v16, %v216_v31  ;;  %v343_v36 = vadd.f32 %v466_v16, %v248_v32 }
  0xea   :  { %v584_v39 = vpop.f32.mrf.mxu0  ;;  %v592_v40 = vpop.f32.mrf.mxu1 }
  0xeb   :  { %v507_v41 = vpack.c.bf16 %v353_v33, %v352_v29  ;;  %v527_v42 = vpack.c.bf16 %v361_v34, %v360_v30  ;;  %v351_v43 = vmax.f32 %v335_v35, 0.0  ;;  %v359_v44 = vmax.f32 %v343_v36, 0.0 }
  0xec   :  { %v340_v45 = vadd.f32 %v584_v39, %v466_v16  ;;  %v348_v46 = vadd.f32 %v592_v40, %v466_v16  ;;  %v229_v47 = vpop.f32.mrf.mxu0  ;;  %v261_v48 = vpop.f32.mrf.mxu1 }
  0xed   :  { %539 = vst [vmem:[%s724_s3 + $0x8] sm:$0xff] %v507_v41   ;;  %543 = vst [vmem:[%s724_s3 + $0x28] sm:$0xff] %v527_v42   ;;  %v502_v49 = vpack.c.bf16 %v351_v43, %v350_v37  ;;  %v522_v50 = vpack.c.bf16 %v359_v44, %v358_v38  ;;  %v338_v51 = vadd.f32 %v466_v16, %v229_v47 }
  0xee   :  { %v346_v52 = vadd.f32 %v466_v16, %v261_v48  ;;  %v585_v53 = vpop.f32.mrf.mxu0  ;;  %v593_v54 = vpop.f32.mrf.mxu1  ;;  %v356_v57 = vmax.f32 %v340_v45, 0.0  ;;  %v364_v58 = vmax.f32 %v348_v46, 0.0 }
  0xef   :  { %503 = vst [vmem:[%s724_s3] sm:$0xff] %v502_v49   ;;  %542 = vst [vmem:[%s724_s3 + $0x20] sm:$0xff] %v522_v50   ;;  %v341_v55 = vadd.f32 %v585_v53, %v466_v16  ;;  %v349_v56 = vadd.f32 %v593_v54, %v466_v16  ;;  %v354_v1 = vmax.f32 %v338_v51, 0.0 }
  0xf0   :  { %v232_v59 = vpop.f32.mrf.mxu0  ;;  %v264_v60 = vpop.f32.mrf.mxu1  ;;  %v362_v2 = vmax.f32 %v346_v52, 0.0 }
  0xf1   :  { %v357_v61 = vmax.f32 %v341_v55, 0.0  ;;  %v365_v62 = vmax.f32 %v349_v56, 0.0  ;;  %v339_v63 = vadd.f32 %v466_v16, %v232_v59  ;;  %v347_v0 = vadd.f32 %v466_v16, %v264_v60 }
  0xf3   :  { %v517_v3 = vpack.c.bf16 %v357_v61, %v356_v57  ;;  %v537_v4 = vpack.c.bf16 %v365_v62, %v364_v58  ;;  %v355_v5 = vmax.f32 %v339_v63, 0.0  ;;  %v363_v6 = vmax.f32 %v347_v0, 0.0 }
  0xf5   :  { %541 = vst [vmem:[%s724_s3 + $0x18] sm:$0xff] %v517_v3   ;;  %545 = vst [vmem:[%s724_s3 + $0x38] sm:$0xff] %v537_v4   ;;  %v512_v7 = vpack.c.bf16 %v355_v5, %v354_v1  ;;  %v532_v8 = vpack.c.bf16 %v363_v6, %v362_v2 }
  0xf7   :  { %540 = vst [vmem:[%s724_s3 + $0x10] sm:$0xff] %v512_v7   ;;  %544 = vst [vmem:[%s724_s3 + $0x30] sm:$0xff] %v532_v8  }

// kernel: spectrogram_vae_forward.9
= control target key start
LH: loop header
LB: loop body
LE: loop exit
PB: predicated region body
PF: predicated region fallthrough
CT: control target
= control target key end

     0   :  { %s670_s1 = inlined_call_operand.vmem [shape: bf16[384,128], index: 1, kind: input, shape index: {}]   ;;  %s671_s0 = inlined_call_operand.vmem [shape: bf16[32,384], index: 0, kind: input, shape index: {}]   ;;  %s672_s2 = inlined_call_operand.vmem [shape: f32[1,128], index: 2, kind: input, shape index: {}]   ;;  %s673_s3 = inlined_call_operand.vmem [shape: bf16[32,128], index: 3, kind: output, shape index: {}]  }
   0x1   :  { %v519_v0 = vld [vmem:[%s670_s1 + $0x78] sm:$0xff]   ;;  %v522_v3 = vld [vmem:[%s670_s1 + $0x70] sm:$0xff]   ;;  %v525_v6 = vld [vmem:[%s670_s1 + $0x68] sm:$0xff]  }
   0x2   :  { %v520_v1 = vld [vmem:[%s670_s1 + $0x38] sm:$0xff]   ;;  %461 = vmatprep.subr.bf16.mxu0 %v519_v0  ;;  %v523_v4 = vld [vmem:[%s670_s1 + $0x30] sm:$0xff]   ;;  %v526_v7 = vld [vmem:[%s670_s1 + $0x28] sm:$0xff]  }
   0x3   :  { %v521_v2 = vld [vmem:[%s670_s1 + $0xb8] sm:$0xff]   ;;  %462 = vmatpush3.bf16.msra.mxu0 %v520_v1  ;;  %v524_v5 = vld [vmem:[%s670_s1 + $0xb0] sm:$0xff]   ;;  %v527_v8 = vld [vmem:[%s670_s1 + $0xa8] sm:$0xff]  }
   0x4   :  { %499 = vmatprep.subr.bf16.mxu1 %v521_v2  ;;  %463 = vmatprep.subr.bf16.mxu0 %v522_v3  ;;  %v528_v9 = vld [vmem:[%s670_s1 + $0x60] sm:$0xff]   ;;  %v531_v12 = vld [vmem:[%s670_s1 + $0x58] sm:$0xff]   ;;  %v534_v15 = vld [vmem:[%s670_s1 + $0x50] sm:$0xff]  }
   0x5   :  { %500 = vmatpush3.bf16.msra.mxu1 %v521_v2  ;;  %v529_v10 = vld [vmem:[%s670_s1 + $0x20] sm:$0xff]   ;;  %v533_v13 = vld [vmem:[%s670_s1 + $0x98] sm:$0xff]   ;;  %v536_v16 = vld [vmem:[%s670_s1 + $0x90] sm:$0xff]  }
   0x6   :  { %501 = vmatprep.subr.bf16.mxu1 %v524_v5  ;;  %v530_v11 = vld [vmem:[%s670_s1 + $0xa0] sm:$0xff]   ;;  %v532_v14 = vld [vmem:[%s670_s1 + $0x18] sm:$0xff]   ;;  %v535_v17 = vld [vmem:[%s670_s1 + $0x10] sm:$0xff]  }
   0x7   :  { %464 = vmatpush3.bf16.msra.mxu0 %v523_v4  ;;  %v537_v18 = vld [vmem:[%s670_s1 + $0x48] sm:$0xff]   ;;  %v540_v21 = vld [vmem:[%s670_s1 + $0x40] sm:$0xff]  }
   0x8   :  { %465 = vmatprep.subr.bf16.mxu0 %v525_v6  ;;  %v538_v19 = vld [vmem:[%s670_s1 + $0x8] sm:$0xff]   ;;  %v542_v22 = vld [vmem:[%s670_s1 + $0x80] sm:$0xff]  }
   0x9   :  { %502 = vmatpush3.bf16.msra.mxu1 %v524_v5  ;;  %v539_v20 = vld [vmem:[%s670_s1 + $0x88] sm:$0xff]   ;;  %v545_v23 = vld [vmem:[%s671_s0 + $0x4] ss:$12 sps:$4 sm:$0xff]   ;;  %v441_v37 = vld [vmem:[%s672_s2] ss:$0 sm:$0xff] }
   0xa   :  { %503 = vmatprep.subr.bf16.mxu1 %v527_v8  ;;  %v546_v24 = vld [vmem:[%s671_s0 + $0x8] ss:$12 sps:$4 sm:$0xff]   ;;  %v541_v25 = vld [vmem:[%s670_s1] sm:$0xff]   ;;  %291 = vmatprep.mubr.bf16.mxu0 %v545_v23 }
   0xb   :  { %466 = vmatpush3.bf16.msra.mxu0 %v526_v7  ;;  %515 = vmatprep.mubr.bf16.mxu1 %v546_v24  ;;  %v543_v26 = vld [vmem:[%s671_s0] ss:$12 sps:$4 sm:$0xff]   ;;  %v548_v27 = vld [vmem:[%s671_s0 + $0x1c] ss:$12 sps:$4 sm:$0xff]   ;;  %v550_v29 = vld [vmem:[%s671_s0 + $0x18] ss:$12 sps:$4 sm:$0xff]  }
   0xc   :  { %467 = vmatprep.subr.bf16.mxu0 %v528_v9  ;;  %v547_v28 = vld [vmem:[%s671_s0 + $0x20] ss:$12 sps:$4 sm:$0xff]  }
   0xd   :  { %504 = vmatpush3.bf16.msra.mxu1 %v527_v8 }
   0xe   :  { %505 = vmatprep.subr.bf16.mxu1 %v530_v11 }
   0xf   :  { %468 = vmatpush3.bf16.msra.mxu0 %v529_v10 }
  0x10   :  { %469 = vmatprep.subr.bf16.mxu0 %v531_v12 }
  0x11   :  { %506 = vmatpush3.bf16.msra.mxu1 %v530_v11 }
  0x12   :  { %507 = vmatprep.subr.bf16.mxu1 %v533_v13 }
  0x13   :  { %470 = vmatpush3.bf16.msra.mxu0 %v532_v14 }
  0x14   :  { %471 = vmatprep.subr.bf16.mxu0 %v534_v15 }
  0x15   :  { %508 = vmatpush3.bf16.msra.mxu1 %v533_v13 }
  0x16   :  { %509 = vmatprep.subr.bf16.mxu1 %v536_v16 }
  0x17   :  { %472 = vmatpush3.bf16.msra.mxu0 %v535_v17 }
  0x18   :  { %473 = vmatprep.subr.bf16.mxu0 %v537_v18 }
  0x19   :  { %510 = vmatpush3.bf16.msra.mxu1 %v536_v16 }
  0x1a   :  { %511 = vmatprep.subr.bf16.mxu1 %v539_v20 }
  0x1b   :  { %474 = vmatpush3.bf16.msra.mxu0 %v538_v19 }
  0x1c   :  { %475 = vmatprep.subr.bf16.mxu0 %v540_v21 }
  0x1d   :  { %512 = vmatpush3.bf16.msra.mxu1 %v539_v20 }
  0x1e   :  { %513 = vmatprep.subr.bf16.mxu1 %v542_v22 }
  0x1f   :  { %476 = vmatpush3.bf16.msra.mxu0 %v541_v25 }
  0x21   :  { %514 = vmatpush3.bf16.msra.mxu1 %v542_v22 }
  0x22   :  { %292 = vmatmul.mubr.bf16.vlgmr.msra.gmra.mxu0 %v543_v26 }
  0x23   :  { %299 = vmatprep.mubr.bf16.mxu0 %v548_v27 }
  0x24   :  { %516 = vmatmul.mubr.bf16.vlgmr.msra.gmra.mxu1 %v547_v28 }
  0x2a   :  { %300 = vmatmul.mubr.bf16.gmra.mxu0 %v550_v29 }
  0xe2   :  { %v477_v30 = vpop.f32.mrf.mxu0 }
  0xe4   :  { %v478_v31 = vpop.f32.mrf.mxu0  ;;  %v517_v32 = vpop.f32.mrf.mxu1 }
  0xe5   :  { %v479_v33 = vadd.f32 %v478_v31, %v477_v30 }
  0xe6   :  { %v480_v34 = vpop.f32.mrf.mxu0  ;;  %v342_v35 = vpop.f32.mrf.mxu1 }
  0xe7   :  { %v343_v36 = vadd.f32 %v479_v33, %v342_v35 }
  0xe8   :  { %v481_v38 = vpop.f32.mrf.mxu0  ;;  %v518_v39 = vpop.f32.mrf.mxu1 }
  0xe9   :  { %v482_v40 = vadd.f32 %v481_v38, %v480_v34  ;;  %v379_v43 = vadd.f32 %v441_v37, %v343_v36 }
  0xea   :  { %v483_v41 = vpop.f32.mrf.mxu0  ;;  %v345_v42 = vpop.f32.mrf.mxu1 }
  0xeb   :  { %v346_v44 = vadd.f32 %v482_v40, %v345_v42  ;;  %v383_v49 = vmax.f32 %v379_v43, 0.0 }
  0xec   :  { %v484_v45 = vpop.f32.mrf.mxu0 }
  0xed   :  { %v380_v46 = vadd.f32 %v441_v37, %v346_v44  ;;  %v485_v47 = vadd.f32 %v484_v45, %v483_v41 }
  0xee   :  { %v486_v48 = vpop.f32.mrf.mxu0 }
  0xef   :  { %v384_v50 = vmax.f32 %v380_v46, 0.0  ;;  %v351_v51 = vadd.f32 %v517_v32, %v485_v47 }
  0xf0   :  { %v487_v52 = vpop.f32.mrf.mxu0 }
  0xf1   :  { %v453_v53 = vpack.c.bf16 %v384_v50, %v383_v49  ;;  %v488_v54 = vadd.f32 %v487_v52, %v486_v48  ;;  %v381_v55 = vadd.f32 %v441_v37, %v351_v51 }
  0xf3   :  { %454 = vst [vmem:[%s673_s3] sm:$0xff] %v453_v53   ;;  %v354_v56 = vadd.f32 %v518_v39, %v488_v54  ;;  %v385_v58 = vmax.f32 %v381_v55, 0.0 }
  0xf5   :  { %v382_v57 = vadd.f32 %v441_v37, %v354_v56 }
  0xf7   :  { %v386_v59 = vmax.f32 %v382_v57, 0.0 }
  0xf9   :  { %v458_v60 = vpack.c.bf16 %v386_v59, %v385_v58 }
  0xfb   :  { %460 = vst [vmem:[%s673_s3 + $0x8] sm:$0xff] %v458_v60  }

// kernel: spectrogram_vae_forward.10
= control target key start
LH: loop header
LB: loop body
LE: loop exit
PB: predicated region body
PF: predicated region fallthrough
CT: control target
= control target key end

     0   :  { %v669_v36 = vmov 0.0   ;;  %vm670_vm0 = vmmov 0   ;;  %s826_s1 = inlined_call_operand.vmem [shape: bf16[640,128], index: 1, kind: input, shape index: {}]   ;;  %s827_s0 = inlined_call_operand.vmem [shape: bf16[8,640], index: 0, kind: input, shape index: {}]   ;;  %s828_s2 = inlined_call_operand.vmem [shape: f32[1,128], index: 2, kind: input, shape index: {}]   ;;  %s829_s3 = inlined_call_operand.vmem [shape: bf16[8,128], index: 3, kind: output, shape index: {}]  }
   0x1   :  { %v624_v0 = vld [vmem:[%s826_s1 + $0x78] sm:$0xff]   ;;  %v628_v4 = vld [vmem:[%s826_s1 + $0x70] sm:$0xff]   ;;  %v632_v8 = vld [vmem:[%s826_s1 + $0x68] sm:$0xff]  }
   0x2   :  { %v625_v1 = vld [vmem:[%s826_s1 + $0xf8] sm:$0xff]   ;;  %549 = vmatprep.subr.bf16.mxu0 %v624_v0  ;;  %v629_v5 = vld [vmem:[%s826_s1 + $0xf0] sm:$0xff]   ;;  %v633_v9 = vld [vmem:[%s826_s1 + $0xe8] sm:$0xff]  }
   0x3   :  { %v626_v2 = vld [vmem:[%s826_s1 + $0x38] sm:$0xff]   ;;  %571 = vmatprep.subr.bf16.mxu1 %v625_v1  ;;  %v630_v6 = vld [vmem:[%s826_s1 + $0x30] sm:$0xff]   ;;  %v634_v10 = vld [vmem:[%s826_s1 + $0x28] sm:$0xff]  }
   0x4   :  { %v627_v3 = vld [vmem:[%s826_s1 + $0xb8] sm:$0xff]   ;;  %550 = vmatpush3.bf16.msra.mxu0 %v626_v2  ;;  %v631_v7 = vld [vmem:[%s826_s1 + $0xb0] sm:$0xff]   ;;  %v635_v11 = vld [vmem:[%s826_s1 + $0xa8] sm:$0xff]  }
   0x5   :  { %572 = vmatpush3.bf16.msra.mxu1 %v627_v3  ;;  %551 = vmatprep.subr.bf16.mxu0 %v628_v4  ;;  %v636_v12 = vld [vmem:[%s826_s1 + $0x60] sm:$0xff]   ;;  %v640_v16 = vld [vmem:[%s826_s1 + $0x58] sm:$0xff]   ;;  %v644_v20 = vld [vmem:[%s826_s1 + $0x50] sm:$0xff]  }
   0x6   :  { %573 = vmatprep.subr.bf16.mxu1 %v629_v5  ;;  %v637_v13 = vld [vmem:[%s826_s1 + $0xe0] sm:$0xff]   ;;  %v641_v17 = vld [vmem:[%s826_s1 + $0xd8] sm:$0xff]   ;;  %v645_v21 = vld [vmem:[%s826_s1 + $0xd0] sm:$0xff]  }
   0x7   :  { %v638_v14 = vld [vmem:[%s826_s1 + $0x20] sm:$0xff]   ;;  %v642_v18 = vld [vmem:[%s826_s1 + $0x18] sm:$0xff]   ;;  %v646_v22 = vld [vmem:[%s826_s1 + $0x10] sm:$0xff]  }
   0x8   :  { %552 = vmatpush3.bf16.msra.mxu0 %v630_v6  ;;  %v639_v15 = vld [vmem:[%s826_s1 + $0xa0] sm:$0xff]   ;;  %v643_v19 = vld [vmem:[%s826_s1 + $0x98] sm:$0xff]   ;;  %v647_v23 = vld [vmem:[%s826_s1 + $0x90] sm:$0xff]  }
   0x9   :  { %574 = vmatpush3.bf16.msra.mxu1 %v631_v7  ;;  %553 = vmatprep.subr.bf16.mxu0 %v632_v8  ;;  %v648_v24 = vld [vmem:[%s826_s1 + $0x48] sm:$0xff]   ;;  %v652_v28 = vld [vmem:[%s826_s1 + $0x40] sm:$0xff]   ;;  %v661_v39 = vld [vmem:[%s826_s1 + $0x138] sm:$0xff]  }
   0xa   :  { %575 = vmatprep.subr.bf16.mxu1 %v633_v9  ;;  %v649_v25 = vld [vmem:[%s826_s1 + $0xc8] sm:$0xff]   ;;  %v653_v29 = vld [vmem:[%s826_s1 + $0xc0] sm:$0xff]   ;;  %v662_v40 = vld [vmem:[%s826_s1 + $0x130] sm:$0xff]  }
   0xb   :  { %v650_v26 = vld [vmem:[%s826_s1 + $0x8] sm:$0xff]   ;;  %v654_v30 = vld [vmem:[%s826_s1] sm:$0xff]   ;;  %v665_v43 = vld [vmem:[%s826_s1 + $0x118] sm:$0xff]  }
   0xc   :  { %554 = vmatpush3.bf16.msra.mxu0 %v634_v10  ;;  %v651_v27 = vld [vmem:[%s826_s1 + $0x88] sm:$0xff]   ;;  %v655_v31 = vld [vmem:[%s826_s1 + $0x80] sm:$0xff]   ;;  %v666_v44 = vld [vmem:[%s826_s1 + $0x110] sm:$0xff]  }
   0xd   :  { %576 = vmatpush3.bf16.msra.mxu1 %v635_v11  ;;  %555 = vmatprep.subr.bf16.mxu0 %v636_v12  ;;  %v21_v32 = vld [vmem:[%s827_s0] sm:$0xff]  ;;  %v22_v35 = vld [vmem:[%s827_s0 + $0x8] sm:$0xff]  ;;  %v658_v47 = vld [vmem:[%s827_s0 + $0x10] ss:$0 sps:$4 sm:$0xff]  }
   0xe   :  { %577 = vmatprep.subr.bf16.mxu1 %v637_v13  ;;  %v503_v33 = vcombine.low %v21_v32, %v21_v32  ;;  %v504_v34 = vcombine.high %v21_v32, %v21_v32  ;;  %v505_v37 = vcombine.low %v22_v35, %v22_v35  ;;  %v506_v38 = vcombine.high %v22_v35, %v22_v35  ;;  %v663_v41 = vld [vmem:[%s826_s1 + $0x128] sm:$0xff]   ;;  %v664_v42 = vld [vmem:[%s826_s1 + $0x120] sm:$0xff]  }
   0xf   :  { %v667_v45 = vld [vmem:[%s826_s1 + $0x108] sm:$0xff]   ;;  %v668_v46 = vld [vmem:[%s826_s1 + $0x100] sm:$0xff]  }
  0x10   :  { %556 = vmatpush3.bf16.msra.mxu0 %v638_v14  ;;  %394 = vmatprep.mubr.bf16.mxu0 %v504_v34  ;;  %v548_v60 = vld [vmem:[%s828_s2] ss:$0 sm:$0xff] }
  0x11   :  { %578 = vmatpush3.bf16.msra.mxu1 %v639_v15  ;;  %557 = vmatprep.subr.bf16.mxu0 %v640_v16 }
  0x12   :  { %579 = vmatprep.subr.bf16.mxu1 %v641_v17  ;;  %434 = vmatprep.mubr.bf16.mxu1 %v506_v38 }
  0x14   :  { %558 = vmatpush3.bf16.msra.mxu0 %v642_v18 }
  0x15   :  { %580 = vmatpush3.bf16.msra.mxu1 %v643_v19  ;;  %559 = vmatprep.subr.bf16.mxu0 %v644_v20 }
  0x16   :  { %581 = vmatprep.subr.bf16.mxu1 %v645_v21 }
  0x18   :  { %560 = vmatpush3.bf16.msra.mxu0 %v646_v22 }
  0x19   :  { %582 = vmatpush3.bf16.msra.mxu1 %v647_v23  ;;  %561 = vmatprep.subr.bf16.mxu0 %v648_v24 }
  0x1a   :  { %583 = vmatprep.subr.bf16.mxu1 %v649_v25 }
  0x1c   :  { %562 = vmatpush3.bf16.msra.mxu0 %v650_v26 }
  0x1d   :  { %584 = vmatpush3.bf16.msra.mxu1 %v651_v27  ;;  %563 = vmatprep.subr.bf16.mxu0 %v652_v28 }
  0x1e   :  { %585 = vmatprep.subr.bf16.mxu1 %v653_v29 }
  0x20   :  { %564 = vmatpush3.bf16.msra.mxu0 %v654_v30 }
  0x21   :  { %586 = vmatpush3.bf16.msra.mxu1 %v655_v31  ;;  %602 = vmatprep.subr.bf16.mxu0 %v669_v36 }
  0x23   :  { %395 = vmatmul.mubr.bf16.vlgmr.msra.gmra.mxu0 %v503_v33 }
  0x24   :  { %435 = vmatmul.mubr.bf16.vlgmr.msra.gmra.mxu1 %v505_v37  ;;  %603 = vmatpush3.bf16.msra.mxu0 %v661_v39 }
  0x25   :  { %604 = vmatprep.subr.bf16.mxu0 %v669_v36  ;;  %618 = vmatprep.mubr.msk.bf16.mxu0 %vm670_vm0, %v669_v36 }
  0x28   :  { %605 = vmatpush3.bf16.msra.mxu0 %v662_v40 }
  0x29   :  { %606 = vmatprep.subr.bf16.mxu0 %v669_v36 }
  0x2c   :  { %607 = vmatpush3.bf16.msra.mxu0 %v663_v41 }
  0x2d   :  { %608 = vmatprep.subr.bf16.mxu0 %v669_v36 }
  0x30   :  { %609 = vmatpush3.bf16.msra.mxu0 %v664_v42 }
  0x31   :  { %610 = vmatprep.subr.bf16.mxu0 %v669_v36 }
  0x34   :  { %611 = vmatpush3.bf16.msra.mxu0 %v665_v43 }
  0x35   :  { %612 = vmatprep.subr.bf16.mxu0 %v669_v36 }
  0x38   :  { %613 = vmatpush3.bf16.msra.mxu0 %v666_v44 }
  0x39   :  { %614 = vmatprep.subr.bf16.mxu0 %v669_v36 }
  0x3c   :  { %615 = vmatpush3.bf16.msra.mxu0 %v667_v45 }
  0x3d   :  { %616 = vmatprep.subr.bf16.mxu0 %v669_v36 }
  0x40   :  { %617 = vmatpush3.bf16.msra.mxu0 %v668_v46 }
  0x43   :  { %619 = vmatmul.mubr.bf16.vlgmr.msra.gmra.mxu0 %v658_v47 }
  0xe3   :  { %v565_v48 = vpop.f32.mrf.mxu0 }
  0xe4   :  { %v587_v49 = vpop.f32.mrf.mxu1 }
  0xe5   :  { %v566_v50 = vpop.f32.mrf.mxu0 }
  0xe6   :  { %v588_v51 = vpop.f32.mrf.mxu1  ;;  %v567_v56 = vadd.f32 %v566_v50, %v565_v48 }
  0xe7   :  { %v568_v52 = vpop.f32.mrf.mxu0  ;;  %v589_v57 = vadd.f32 %v588_v51, %v587_v49 }
  0xe8   :  { %v590_v53 = vpop.f32.mrf.mxu1 }
  0xe9   :  { %v569_v54 = vpop.f32.mrf.mxu0  ;;  %v437_v58 = vadd.f32 %v589_v57, %v567_v56 }
  0xea   :  { %v591_v55 = vpop.f32.mrf.mxu1 }
 0x103   :  { %v476_v59 = vpop.f32.mrf.mxu0 }
 0x104   :  { %v477_v61 = vadd.f32 %v476_v59, %v437_v58 }
 0x105   :  { %v620_v62 = vpop.f32.mrf.mxu0 }
 0x106   :  { %v495_v63 = vadd.f32 %v548_v60, %v477_v61 }
 0x107   :  { %v479_v0 = vpop.f32.mrf.mxu0 }
 0x108   :  { %v496_v1 = vmax.f32 %v495_v63, 0.0 }
 0x109   :  { %v621_v2 = vpop.f32.mrf.mxu0 }
 0x10a   :  { %v497_v3 = vpack.c.bf16 %v496_v1, %v496_v1 }
 0x10c   :  { %498 = vst [vmem:[%s829_s3] sm:$0xf] %v497_v3 }

// kernel: spectrogram_vae_forward.11
= control target key start
LH: loop header
LB: loop body
LE: loop exit
PB: predicated region body
PF: predicated region fallthrough
CT: control target
= control target key end

     0   :  { %s637_s1 = inlined_call_operand.vmem [shape: bf16[512,128], index: 1, kind: input, shape index: {}]   ;;  %s638_s0 = inlined_call_operand.vmem [shape: bf16[8,512], index: 0, kind: input, shape index: {}]   ;;  %s639_s2 = inlined_call_operand.vmem [shape: f32[1,128], index: 2, kind: input, shape index: {}]   ;;  %s640_s3 = inlined_call_operand.vmem [shape: f32[8,128], index: 3, kind: output, shape index: {}]  }
   0x1   :  { %v473_v0 = vld [vmem:[%s637_s1 + $0x78] sm:$0xff]   ;;  %v477_v4 = vld [vmem:[%s637_s1 + $0x70] sm:$0xff]   ;;  %v481_v8 = vld [vmem:[%s637_s1 + $0x68] sm:$0xff]  }
   0x2   :  { %v474_v1 = vld [vmem:[%s637_s1 + $0xf8] sm:$0xff]   ;;  %429 = vmatprep.subr.bf16.mxu0 %v473_v0  ;;  %v478_v5 = vld [vmem:[%s637_s1 + $0xf0] sm:$0xff]   ;;  %v482_v9 = vld [vmem:[%s637_s1 + $0xe8] sm:$0xff]  }
   0x3   :  { %v475_v2 = vld [vmem:[%s637_s1 + $0x38] sm:$0xff]   ;;  %451 = vmatprep.subr.bf16.mxu1 %v474_v1  ;;  %v479_v6 = vld [vmem:[%s637_s1 + $0x30] sm:$0xff]   ;;  %v483_v10 = vld [vmem:[%s637_s1 + $0x28] sm:$0xff]  }
   0x4   :  { %v476_v3 = vld [vmem:[%s637_s1 + $0xb8] sm:$0xff]   ;;  %430 = vmatpush3.bf16.msra.mxu0 %v475_v2  ;;  %v480_v7 = vld [vmem:[%s637_s1 + $0xb0] sm:$0xff]   ;;  %v484_v11 = vld [vmem:[%s637_s1 + $0xa8] sm:$0xff]  }
   0x5   :  { %452 = vmatpush3.bf16.msra.mxu1 %v476_v3  ;;  %431 = vmatprep.subr.bf16.mxu0 %v477_v4  ;;  %v485_v12 = vld [vmem:[%s637_s1 + $0x60] sm:$0xff]   ;;  %v489_v16 = vld [vmem:[%s637_s1 + $0x58] sm:$0xff]   ;;  %v493_v20 = vld [vmem:[%s637_s1 + $0x50] sm:$0xff]  }
   0x6   :  { %453 = vmatprep.subr.bf16.mxu1 %v478_v5  ;;  %v486_v13 = vld [vmem:[%s637_s1 + $0xe0] sm:$0xff]   ;;  %v490_v17 = vld [vmem:[%s637_s1 + $0xd8] sm:$0xff]   ;;  %v494_v21 = vld [vmem:[%s637_s1 + $0xd0] sm:$0xff]  }
   0x7   :  { %v487_v14 = vld [vmem:[%s637_s1 + $0x20] sm:$0xff]   ;;  %v491_v18 = vld [vmem:[%s637_s1 + $0x18] sm:$0xff]   ;;  %v495_v22 = vld [vmem:[%s637_s1 + $0x10] sm:$0xff]  }
   0x8   :  { %432 = vmatpush3.bf16.msra.mxu0 %v479_v6  ;;  %v488_v15 = vld [vmem:[%s637_s1 + $0xa0] sm:$0xff]   ;;  %v492_v19 = vld [vmem:[%s637_s1 + $0x98] sm:$0xff]   ;;  %v496_v23 = vld [vmem:[%s637_s1 + $0x90] sm:$0xff]  }
   0x9   :  { %454 = vmatpush3.bf16.msra.mxu1 %v480_v7  ;;  %433 = vmatprep.subr.bf16.mxu0 %v481_v8  ;;  %v497_v24 = vld [vmem:[%s637_s1 + $0x48] sm:$0xff]   ;;  %v501_v28 = vld [vmem:[%s637_s1 + $0x40] sm:$0xff]  }
   0xa   :  { %455 = vmatprep.subr.bf16.mxu1 %v482_v9  ;;  %v498_v25 = vld [vmem:[%s637_s1 + $0xc8] sm:$0xff]   ;;  %v502_v29 = vld [vmem:[%s637_s1 + $0xc0] sm:$0xff]  }
   0xb   :  { %v499_v26 = vld [vmem:[%s637_s1 + $0x8] sm:$0xff]   ;;  %v503_v30 = vld [vmem:[%s637_s1] sm:$0xff]  }
   0xc   :  { %434 = vmatpush3.bf16.msra.mxu0 %v483_v10  ;;  %v500_v27 = vld [vmem:[%s637_s1 + $0x88] sm:$0xff]   ;;  %v504_v31 = vld [vmem:[%s637_s1 + $0x80] sm:$0xff]  }
   0xd   :  { %456 = vmatpush3.bf16.msra.mxu1 %v484_v11  ;;  %435 = vmatprep.subr.bf16.mxu0 %v485_v12  ;;  %v21_v32 = vld [vmem:[%s638_s0] sm:$0xff]  ;;  %v22_v33 = vld [vmem:[%s638_s0 + $0x8] sm:$0xff] }
   0xe   :  { %457 = vmatprep.subr.bf16.mxu1 %v486_v13  ;;  %v392_v34 = vcombine.low %v21_v32, %v21_v32  ;;  %v393_v35 = vcombine.high %v21_v32, %v21_v32  ;;  %v394_v36 = vcombine.low %v22_v33, %v22_v33  ;;  %v395_v37 = vcombine.high %v22_v33, %v22_v33  ;;  %v428_v44 = vld [vmem:[%s639_s2] ss:$0 sm:$0xff] }
  0x10   :  { %436 = vmatpush3.bf16.msra.mxu0 %v487_v14  ;;  %325 = vmatprep.mubr.bf16.mxu0 %v393_v35 }
  0x11   :  { %458 = vmatpush3.bf16.msra.mxu1 %v488_v15  ;;  %437 = vmatprep.subr.bf16.mxu0 %v489_v16 }
  0x12   :  { %459 = vmatprep.subr.bf16.mxu1 %v490_v17  ;;  %365 = vmatprep.mubr.bf16.mxu1 %v395_v37 }
  0x14   :  { %438 = vmatpush3.bf16.msra.mxu0 %v491_v18 }
  0x15   :  { %460 = vmatpush3.bf16.msra.mxu1 %v492_v19  ;;  %439 = vmatprep.subr.bf16.mxu0 %v493_v20 }
  0x16   :  { %461 = vmatprep.subr.bf16.mxu1 %v494_v21 }
  0x18   :  { %440 = vmatpush3.bf16.msra.mxu0 %v495_v22 }
  0x19   :  { %462 = vmatpush3.bf16.msra.mxu1 %v496_v23  ;;  %441 = vmatprep.subr.bf16.mxu0 %v497_v24 }
  0x1a   :  { %463 = vmatprep.subr.bf16.mxu1 %v498_v25 }
  0x1c   :  { %442 = vmatpush3.bf16.msra.mxu0 %v499_v26 }
  0x1d   :  { %464 = vmatpush3.bf16.msra.mxu1 %v500_v27  ;;  %443 = vmatprep.subr.bf16.mxu0 %v501_v28 }
  0x1e   :  { %465 = vmatprep.subr.bf16.mxu1 %v502_v29 }
  0x20   :  { %444 = vmatpush3.bf16.msra.mxu0 %v503_v30 }
  0x21   :  { %466 = vmatpush3.bf16.msra.mxu1 %v504_v31 }
  0x23   :  { %326 = vmatmul.mubr.bf16.vlgmr.msra.gmra.mxu0 %v392_v34 }
  0x24   :  { %366 = vmatmul.mubr.bf16.vlgmr.msra.gmra.mxu1 %v394_v36 }
  0xe3   :  { %v445_v38 = vpop.f32.mrf.mxu0 }
  0xe4   :  { %v467_v39 = vpop.f32.mrf.mxu1 }
  0xe5   :  { %v446_v40 = vpop.f32.mrf.mxu0 }
  0xe6   :  { %v468_v41 = vpop.f32.mrf.mxu1  ;;  %v447_v42 = vadd.f32 %v446_v40, %v445_v38 }
  0xe7   :  { %v469_v43 = vadd.f32 %v468_v41, %v467_v39  ;;  %v448_v45 = vpop.f32.mrf.mxu0 }
  0xe8   :  { %v470_v46 = vpop.f32.mrf.mxu1 }
  0xe9   :  { %v368_v47 = vadd.f32 %v469_v43, %v447_v42  ;;  %v449_v48 = vpop.f32.mrf.mxu0 }
  0xea   :  { %v471_v49 = vpop.f32.mrf.mxu1 }
  0xeb   :  { %v386_v50 = vadd.f32 %v428_v44, %v368_v47 }
  0xed   :  { %387 = vst [vmem:[%s640_s3] sm:$0xff] %v386_v50 }

// kernel: spectrogram_vae_forward.12
= control target key start
LH: loop header
LB: loop body
LE: loop exit
PB: predicated region body
PF: predicated region fallthrough
CT: control target
= control target key end

     0   :  { %s898_s18 = smov 0   ;;  %s900_s19 = smov 0   ;;  %s1011_s0 = inlined_call_operand.vmem [shape: f32[8,128], index: 0, kind: input, shape index: {}]   ;;  %s1012_s1 = inlined_call_operand.vmem [shape: f32[8,128], index: 1, kind: input, shape index: {}]   ;;  %s1013_s2 = inlined_call_operand.vmem [shape: f32[8,128], index: 2, kind: input, shape index: {}]   ;;  %s1014_s3 = inlined_call_operand.vmem [shape: bf16[128,512], index: 3, kind: input, shape index: {}]   ;;  %s1015_s4 = inlined_call_operand.vmem [shape: f32[1,512], index: 4, kind: input, shape index: {}]   ;;  %s1016_s5 = inlined_call_operand.vmem [shape: bf16[8,512], index: 5, kind: output, shape index: {}]  }
   0x1   :  { %s902_s20 = smov 0   ;;  %s904_s21 = smov 0  }
   0x2   :  { %s906_s22 = smov 0  }
   0x3 LB: > { %s24_s23 = sadd.s32 1, %s861_s21  ;;  %p119_p1 = scmp.ne.s32.totalorder %s853_s19, %s849_s18  ;;  %s865_s22 = sphi %s906_s22, %s15_s22   ;;  %s861_s21 = sphi %s904_s21, %s1020_s21   ;;  %s857_s20 = sphi %s902_s20, %s1019_s20   ;;  %s853_s19 = sphi %s900_s19, %s1018_s19   ;;  %s849_s18 = sphi %s898_s18, %s1017_s18  }
   0x4   : > { %p25_p0 = scmp.ge.s32.totalorder %s24_s23, 2  ;;  %p120_p2 = scmp.eq.s32.totalorder %s865_s22, 0 }
   0x5   : > { %s112_s25 = sadd.s32 1, %s853_s19  ;;  %p730_p5 = scmp.ge.s32.totalorder %s865_s22, 2 }
   0x6   : > { %s1022_s23 = smov (%p25_p0, %s24_s23), 0  ;;  %p121_p3 = por %p120_p2, %p119_p1 }
   0x7   : > { %s109_s24 = ssub.s32 %s861_s21, %s1022_s23  ;;  %220 = sbr.rel (%p730_p5) target bundleno = 24 (0x18), region = 28 }
   0x8   : > { %p110_p4 = scmp.eq.s32.totalorder %s109_s24, 0 }
   0xa   : > { %s933_s26 = scalar_select %p110_p4, %s853_s19, %s112_s25  }
   0xc   : > { %223 = sbr.rel (!%p121_p3) target bundleno = 24 (0x18), region = 32  ;;  %s225_s27 = sand.u32 (%p121_p3), 1, %s853_s19  }
   0xd   : > { %s758_s28 = sshll.u32 (%p121_p3), %s861_s21, 3  ;;  %s731_s29 = sshll.u32 (%p121_p3), %s225_s27, 7 }
   0xe   : > { %s941_s7 = scalar_lea.vmem (%p121_p3), %s1014_s3, %s758_s28  ;;  %s227_s8 = scalar_lea.vmem (%p121_p3), [#allocation2], %s731_s29 }
   0xf   : > { %v289_v0 = vld [vmem:[%s941_s7] sm:$0xff] (%p121_p3)  ;;  %v291_v1 = vld [vmem:[%s941_s7 + $0x10] sm:$0xff] (%p121_p3) }
  0x10   : > { %v293_v2 = vld [vmem:[%s941_s7 + $0x20] sm:$0xff] (%p121_p3)  ;;  %290 = vst [vmem:[%s227_s8] sm:$0xff] (%p121_p3), %v289_v0  ;;  %292 = vst [vmem:[%s227_s8 + $0x8] sm:$0xff] (%p121_p3), %v291_v1  ;;  %v295_v3 = vld [vmem:[%s941_s7 + $0x30] sm:$0xff] (%p121_p3) }
  0x11   : > { %294 = vst [vmem:[%s227_s8 + $0x10] sm:$0xff] %v293_v2  ;;  %v297_v4 = vld [vmem:[%s941_s7 + $0x40] sm:$0xff]  ;;  %v299_v5 = vld [vmem:[%s941_s7 + $0x50] sm:$0xff]  ;;  %296 = vst [vmem:[%s227_s8 + $0x18] sm:$0xff] %v295_v3 }
  0x12   : > { %298 = vst [vmem:[%s227_s8 + $0x20] sm:$0xff] %v297_v4  ;;  %300 = vst [vmem:[%s227_s8 + $0x28] sm:$0xff] %v299_v5  ;;  %v301_v6 = vld [vmem:[%s941_s7 + $0x60] sm:$0xff]  ;;  %v303_v7 = vld [vmem:[%s941_s7 + $0x70] sm:$0xff] }
  0x13   : > { %v305_v8 = vld [vmem:[%s941_s7 + $0x80] sm:$0xff]  ;;  %302 = vst [vmem:[%s227_s8 + $0x30] sm:$0xff] %v301_v6  ;;  %304 = vst [vmem:[%s227_s8 + $0x38] sm:$0xff] %v303_v7  ;;  %v307_v9 = vld [vmem:[%s941_s7 + $0x90] sm:$0xff] }
  0x14   : > { %306 = vst [vmem:[%s227_s8 + $0x40] sm:$0xff] %v305_v8  ;;  %v309_v10 = vld [vmem:[%s941_s7 + $0xa0] sm:$0xff]  ;;  %v311_v11 = vld [vmem:[%s941_s7 + $0xb0] sm:$0xff]  ;;  %308 = vst [vmem:[%s227_s8 + $0x48] sm:$0xff] %v307_v9 }
  0x15   : > { %310 = vst [vmem:[%s227_s8 + $0x50] sm:$0xff] %v309_v10  ;;  %312 = vst [vmem:[%s227_s8 + $0x58] sm:$0xff] %v311_v11  ;;  %v313_v12 = vld [vmem:[%s941_s7 + $0xc0] sm:$0xff]  ;;  %v315_v13 = vld [vmem:[%s941_s7 + $0xd0] sm:$0xff] }
  0x16   : > { %v317_v14 = vld [vmem:[%s941_s7 + $0xe0] sm:$0xff]  ;;  %314 = vst [vmem:[%s227_s8 + $0x60] sm:$0xff] %v313_v12  ;;  %316 = vst [vmem:[%s227_s8 + $0x68] sm:$0xff] %v315_v13  ;;  %v319_v15 = vld [vmem:[%s941_s7 + $0xf0] sm:$0xff] }
  0x17   : > { %318 = vst [vmem:[%s227_s8 + $0x70] sm:$0xff] %v317_v14  ;;  %320 = vst [vmem:[%s227_s8 + $0x78] sm:$0xff] %v319_v15 }
  0x18 PF: > { %p734_p6 = scmp.ge.s32.totalorder %s865_s22, 1  ;;  %p333_p7 = scmp.lt.s32.totalorder %s865_s22, 3 }
  0x1a   : > { %p334_p8 = pnand %p734_p6, %p333_p7 }
  0x1b   : > { %s340_s9 = sand.u32 (!%p334_p8), 1, %s849_s18   ;;  %s736_s18 = sshll.u32 (!%p334_p8), %s857_s20, 1 }
  0x1c   : > { %337 = sbr.rel (%p334_p8) target bundleno = 266 (0x10a), region = 74  ;;  %s735_s12 = sshll.u32 (!%p334_p8), %s340_s9, 7 }
  0x1d   : > { %s965_s13 = scalar_lea.vmem (!%p334_p8), [#allocation2], %s735_s12  ;;  %p401_p9 = scmp.lt.s32.totalorder (!%p334_p8), %s736_s18, 3 }
  0x21   : > { %v418_v16 = vld [vmem:[%s1012_s1] sm:$0xff]  ;;  %v867_v17 = vmov 0   ;;  %v801_v19 = vld [vmem:[%s965_s13 + $0x74] ss:$8 sps:$4 sm:$0xff]   ;;  %v803_v20 = vld [vmem:[%s965_s13 + $0x70] ss:$8 sps:$4 sm:$0xff]   ;;  %v443_v42 = vlaneseq }
  0x22   : > { %565 = vmatprep.mubr.bf16.mxu0 %v867_v17  ;;  %v419_v18 = vmul.f32 0.5, %v418_v16  ;;  %533 = vmatprep.subr.bf16.mxu0 %v801_v19  ;;  %v804_v21 = vld [vmem:[%s965_s13 + $0x64] ss:$8 sps:$4 sm:$0xff]   ;;  %v806_v23 = vld [vmem:[%s965_s13 + $0x60] ss:$8 sps:$4 sm:$0xff]   ;;  %s1024_s18 = smov (!%p401_p9, %s736_s18), 3 }
  0x23   : > { %534 = vmatpush1.bf16.msra.mxu0 %v803_v20  ;;  %v807_v24 = vld [vmem:[%s965_s13 + $0x54] ss:$8 sps:$4 sm:$0xff]   ;;  %v809_v25 = vld [vmem:[%s965_s13 + $0x50] ss:$8 sps:$4 sm:$0xff]   ;;  %v810_v26 = vld [vmem:[%s965_s13 + $0x44] ss:$8 sps:$4 sm:$0xff]   ;;  %s403_s27 = scalar_lea.vmem %s1015_s4, %s1024_s18 }
  0x24   : > { %v420_v22 = vmul.f32 1.442695, %v419_v18  ;;  %535 = vmatprep.subr.bf16.mxu0 %v804_v21  ;;  %v812_v27 = vld [vmem:[%s965_s13 + $0x40] ss:$8 sps:$4 sm:$0xff]   ;;  %v813_v28 = vld [vmem:[%s965_s13 + $0x34] ss:$8 sps:$4 sm:$0xff]  }
  0x25   : > { %v815_v29 = vld [vmem:[%s965_s13 + $0x30] ss:$8 sps:$4 sm:$0xff]   ;;  %v816_v30 = vld [vmem:[%s965_s13 + $0x24] ss:$8 sps:$4 sm:$0xff]   ;;  %v818_v32 = vld [vmem:[%s965_s13 + $0x20] ss:$8 sps:$4 sm:$0xff]  }
  0x26   : > { %825 = vpow2.f32 %v420_v22  ;;  %v417_v33 = vld [vmem:[%s1013_s2] sm:$0xff]  ;;  %v819_v34 = vld [vmem:[%s965_s13 + $0x14] ss:$8 sps:$4 sm:$0xff]   ;;  %v821_v36 = vld [vmem:[%s965_s13 + $0x10] ss:$8 sps:$4 sm:$0xff]   ;;  %v444_v43 = vshrl.u32 %v443_v42, 7 }
  0x27   : > { %536 = vmatpush1.bf16.msra.mxu0 %v806_v23  ;;  %v416_v37 = vld [vmem:[%s1011_s0] sm:$0xff]  ;;  %s738_s28 = sshll.u32 %s1024_s18, 2 }
  0x28   : > { %537 = vmatprep.subr.bf16.mxu0 %v807_v24  ;;  %v822_v38 = vld [vmem:[%s965_s13 + $0x4] ss:$8 sps:$4 sm:$0xff]   ;;  %v824_v40 = vld [vmem:[%s965_s13] ss:$8 sps:$4 sm:$0xff]   ;;  %v445_v44 = vsub.s32 0, %v444_v43  ;;  %v449_v45 = vsub.s32 1, %v444_v43  ;;  %s413_s30 = scalar_lea.vmem %s1016_s5, %s738_s28 }
  0x29   : > { %v441_v46 = vld [vmem:[%s403_s27] sm:$0x3] }
  0x2a   : > { %v446_v47 = vrot.slane %v441_v46, %v445_v44  ;;  %v450_v48 = vrot.slane %v441_v46, %v449_v45 }
  0x2b   : > { %538 = vmatpush1.bf16.msra.mxu0 %v809_v25 }
  0x2c   : > { %539 = vmatprep.subr.bf16.mxu0 %v810_v26 }
  0x2f   : > { %540 = vmatpush1.bf16.msra.mxu0 %v812_v27 }
  0x30   : > { %541 = vmatprep.subr.bf16.mxu0 %v813_v28 }
  0x33   : > { %v826_v31 = vpop.eup %825  ;;  %542 = vmatpush1.bf16.msra.mxu0 %v815_v29 }
  0x34   : > { %543 = vmatprep.subr.bf16.mxu0 %v816_v30  ;;  %v422_v35 = vmul.f32 %v826_v31, %v417_v33 }
  0x36   : > { %v423_v39 = vadd.f32 %v422_v35, %v416_v37 }
  0x37   : > { %544 = vmatpush1.bf16.msra.mxu0 %v818_v32 }
  0x38   : > { %545 = vmatprep.subr.bf16.mxu0 %v819_v34  ;;  %v424_v41 = vpack.c.bf16 %v423_v39, %v423_v39 }
  0x3b   : > { %546 = vmatpush1.bf16.msra.mxu0 %v821_v36 }
  0x3c   : > { %547 = vmatprep.subr.bf16.mxu0 %v822_v38 }
  0x3f   : > { %548 = vmatpush1.bf16.msra.mxu0 %v824_v40 }
  0x42   : > { %566 = vmatmul.mubr.bf16.vlgmr.msra.gmra.mxu0 %v424_v41 }
 0x102   : > { %v567_v49 = vpop.f32.mrf.mxu0 }
 0x103   : > { %v568_v51 = vadd.f32 %v567_v49, %v446_v47 }
 0x104   : > { %v569_v50 = vpop.f32.mrf.mxu0 }
 0x105   : > { %v570_v52 = vadd.f32 %v569_v50, %v450_v48 }
 0x106   : > { %v571_v53 = vpop.f32.mrf.mxu0 }
 0x107   : > { %v759_v54 = vpack.c.bf16 %v570_v52, %v568_v51 }
 0x108   : > { %v572_v55 = vpop.f32.mrf.mxu0 }
 0x109   : > { %582 = vst [vmem:[%s413_s30] sm:$0xff] %v759_v54 }
 0x10a PF: > { %s15_s22 = sadd.s32 1, %s865_s22   ;;  %s1017_s18 = smov %s853_s19 }
 0x10b   : > { %p12_p10 = scmp.ge.s32.totalorder %s15_s22, 4   ;;  %s1018_s19 = smov %s933_s26 }
 0x10c   : > { %s1019_s20 = smov %s861_s21  ;;  %s1020_s21 = smov %s1022_s23 }
 0x10d   :  { %14 = sbr.rel (!%p12_p10) target bundleno = 3 (0x3), region = 125 }

// kernel: spectrogram_vae_forward.13
= control target key start
LH: loop header
LB: loop body
LE: loop exit
PB: predicated region body
PF: predicated region fallthrough
CT: control target
= control target key end

     0   :  { %s936_s1 = inlined_call_operand.vmem [shape: bf16[512,256], index: 1, kind: input, shape index: {}]   ;;  %s937_s0 = inlined_call_operand.vmem [shape: bf16[8,512], index: 0, kind: input, shape index: {}]   ;;  %s938_s2 = inlined_call_operand.vmem [shape: f32[1,256], index: 2, kind: input, shape index: {}]   ;;  %s939_s3 = inlined_call_operand.vmem [shape: bf16[8,256], index: 3, kind: output, shape index: {}]  }
   0x1   :  { %v612_v0 = vld [vmem:[%s936_s1 + $0x74] ss:$8 sps:$4 sm:$0xff]   ;;  %v616_v2 = vld [vmem:[%s936_s1 + $0x70] ss:$8 sps:$4 sm:$0xff]   ;;  %v618_v4 = vld [vmem:[%s936_s1 + $0x64] ss:$8 sps:$4 sm:$0xff]  }
   0x2   :  { %v614_v1 = vld [vmem:[%s936_s1 + $0x174] ss:$8 sps:$4 sm:$0xff]   ;;  %422 = vmatprep.subr.bf16.mxu0 %v612_v0  ;;  %v617_v3 = vld [vmem:[%s936_s1 + $0x170] ss:$8 sps:$4 sm:$0xff]   ;;  %v620_v5 = vld [vmem:[%s936_s1 + $0x164] ss:$8 sps:$4 sm:$0xff]  }
   0x3   :  { %463 = vmatprep.subr.bf16.mxu1 %v614_v1  ;;  %423 = vmatpush1.bf16.msra.mxu0 %v616_v2  ;;  %v622_v6 = vld [vmem:[%s936_s1 + $0x60] ss:$8 sps:$4 sm:$0xff]   ;;  %v624_v8 = vld [vmem:[%s936_s1 + $0x54] ss:$8 sps:$4 sm:$0xff]   ;;  %v628_v10 = vld [vmem:[%s936_s1 + $0x50] ss:$8 sps:$4 sm:$0xff]  }
   0x4   :  { %464 = vmatpush1.bf16.msra.mxu1 %v617_v3  ;;  %424 = vmatprep.subr.bf16.mxu0 %v618_v4  ;;  %v623_v7 = vld [vmem:[%s936_s1 + $0x160] ss:$8 sps:$4 sm:$0xff]   ;;  %v626_v9 = vld [vmem:[%s936_s1 + $0x154] ss:$8 sps:$4 sm:$0xff]   ;;  %v629_v11 = vld [vmem:[%s936_s1 + $0x150] ss:$8 sps:$4 sm:$0xff]  }
   0x5   :  { %465 = vmatprep.subr.bf16.mxu1 %v620_v5  ;;  %v630_v12 = vld [vmem:[%s936_s1 + $0x44] ss:$8 sps:$4 sm:$0xff]   ;;  %v634_v14 = vld [vmem:[%s936_s1 + $0x40] ss:$8 sps:$4 sm:$0xff]   ;;  %v636_v16 = vld [vmem:[%s936_s1 + $0x34] ss:$8 sps:$4 sm:$0xff]  }
   0x6   :  { %v632_v13 = vld [vmem:[%s936_s1 + $0x144] ss:$8 sps:$4 sm:$0xff]   ;;  %v635_v15 = vld [vmem:[%s936_s1 + $0x140] ss:$8 sps:$4 sm:$0xff]   ;;  %v638_v17 = vld [vmem:[%s936_s1 + $0x134] ss:$8 sps:$4 sm:$0xff]  }
   0x7   :  { %425 = vmatpush1.bf16.msra.mxu0 %v622_v6  ;;  %v640_v18 = vld [vmem:[%s936_s1 + $0x30] ss:$8 sps:$4 sm:$0xff]   ;;  %v642_v20 = vld [vmem:[%s936_s1 + $0x24] ss:$8 sps:$4 sm:$0xff]   ;;  %v646_v22 = vld [vmem:[%s936_s1 + $0x20] ss:$8 sps:$4 sm:$0xff]   ;;  %v515_v6 = vlaneseq }
   0x8   :  { %466 = vmatpush1.bf16.msra.mxu1 %v623_v7  ;;  %426 = vmatprep.subr.bf16.mxu0 %v624_v8  ;;  %v641_v19 = vld [vmem:[%s936_s1 + $0x130] ss:$8 sps:$4 sm:$0xff]   ;;  %v644_v21 = vld [vmem:[%s936_s1 + $0x124] ss:$8 sps:$4 sm:$0xff]   ;;  %v647_v23 = vld [vmem:[%s936_s1 + $0x120] ss:$8 sps:$4 sm:$0xff]  }
   0x9   :  { %467 = vmatprep.subr.bf16.mxu1 %v626_v9  ;;  %v648_v24 = vld [vmem:[%s936_s1 + $0x14] ss:$8 sps:$4 sm:$0xff]   ;;  %v652_v26 = vld [vmem:[%s936_s1 + $0x10] ss:$8 sps:$4 sm:$0xff]   ;;  %v654_v28 = vld [vmem:[%s936_s1 + $0x4] ss:$8 sps:$4 sm:$0xff]  }
   0xa   :  { %v650_v25 = vld [vmem:[%s936_s1 + $0x114] ss:$8 sps:$4 sm:$0xff]   ;;  %v653_v27 = vld [vmem:[%s936_s1 + $0x110] ss:$8 sps:$4 sm:$0xff]   ;;  %v656_v29 = vld [vmem:[%s936_s1 + $0x104] ss:$8 sps:$4 sm:$0xff]  }
   0xb   :  { %427 = vmatpush1.bf16.msra.mxu0 %v628_v10  ;;  %v658_v30 = vld [vmem:[%s936_s1] ss:$8 sps:$4 sm:$0xff]   ;;  %v660_v32 = vld [vmem:[%s936_s1 + $0xf4] ss:$8 sps:$4 sm:$0xff]   ;;  %v664_v34 = vld [vmem:[%s936_s1 + $0xf0] ss:$8 sps:$4 sm:$0xff]  }
   0xc   :  { %468 = vmatpush1.bf16.msra.mxu1 %v629_v11  ;;  %428 = vmatprep.subr.bf16.mxu0 %v630_v12  ;;  %v659_v31 = vld [vmem:[%s936_s1 + $0x100] ss:$8 sps:$4 sm:$0xff]   ;;  %v662_v33 = vld [vmem:[%s936_s1 + $0x1f4] ss:$8 sps:$4 sm:$0xff]   ;;  %v665_v35 = vld [vmem:[%s936_s1 + $0x1f0] ss:$8 sps:$4 sm:$0xff]  }
   0xd   :  { %469 = vmatprep.subr.bf16.mxu1 %v632_v13  ;;  %v666_v36 = vld [vmem:[%s936_s1 + $0xe4] ss:$8 sps:$4 sm:$0xff]   ;;  %v670_v38 = vld [vmem:[%s936_s1 + $0xe0] ss:$8 sps:$4 sm:$0xff]   ;;  %v672_v40 = vld [vmem:[%s936_s1 + $0xd4] ss:$8 sps:$4 sm:$0xff]  }
   0xe   :  { %v668_v37 = vld [vmem:[%s936_s1 + $0x1e4] ss:$8 sps:$4 sm:$0xff]   ;;  %v671_v39 = vld [vmem:[%s936_s1 + $0x1e0] ss:$8 sps:$4 sm:$0xff]   ;;  %v674_v41 = vld [vmem:[%s936_s1 + $0x1d4] ss:$8 sps:$4 sm:$0xff]  }
   0xf   :  { %429 = vmatpush1.bf16.msra.mxu0 %v634_v14  ;;  %v676_v42 = vld [vmem:[%s936_s1 + $0xd0] ss:$8 sps:$4 sm:$0xff]   ;;  %v678_v44 = vld [vmem:[%s936_s1 + $0xc4] ss:$8 sps:$4 sm:$0xff]   ;;  %v682_v49 = vld [vmem:[%s936_s1 + $0xc0] ss:$8 sps:$4 sm:$0xff]  }
  0x10   :  { %470 = vmatpush1.bf16.msra.mxu1 %v635_v15  ;;  %430 = vmatprep.subr.bf16.mxu0 %v636_v16  ;;  %v677_v43 = vld [vmem:[%s936_s1 + $0x1d0] ss:$8 sps:$4 sm:$0xff]   ;;  %v680_v45 = vld [vmem:[%s936_s1 + $0x1c4] ss:$8 sps:$4 sm:$0xff]   ;;  %v683_v50 = vld [vmem:[%s936_s1 + $0x1c0] ss:$8 sps:$4 sm:$0xff]  }
  0x11   :  { %471 = vmatprep.subr.bf16.mxu1 %v638_v17  ;;  %v22_v46 = vld [vmem:[%s937_s0] sm:$0xff]  ;;  %v23_v48 = vld [vmem:[%s937_s0 + $0x8] sm:$0xff]  ;;  %v684_v52 = vld [vmem:[%s936_s1 + $0xb4] ss:$8 sps:$4 sm:$0xff]   ;;  %v516_v7 = vshrl.u32 %v515_v6, 7 }
  0x12   :  { %v543_v47 = vcombine.high %v22_v46, %v22_v46  ;;  %v545_v51 = vcombine.high %v23_v48, %v23_v48  ;;  %v686_v53 = vld [vmem:[%s936_s1 + $0x1b4] ss:$8 sps:$4 sm:$0xff]   ;;  %v688_v54 = vld [vmem:[%s936_s1 + $0xb0] ss:$8 sps:$4 sm:$0xff]   ;;  %v690_v56 = vld [vmem:[%s936_s1 + $0xa4] ss:$8 sps:$4 sm:$0xff]   ;;  %v542_v4 = vcombine.low %v22_v46, %v22_v46  ;;  %v544_v5 = vcombine.low %v23_v48, %v23_v48 }
  0x13   :  { %431 = vmatpush1.bf16.msra.mxu0 %v640_v18  ;;  %v689_v55 = vld [vmem:[%s936_s1 + $0x1b0] ss:$8 sps:$4 sm:$0xff]   ;;  %v692_v57 = vld [vmem:[%s936_s1 + $0x1a4] ss:$8 sps:$4 sm:$0xff]   ;;  %v694_v58 = vld [vmem:[%s936_s1 + $0xa0] ss:$8 sps:$4 sm:$0xff]  }
  0x14   :  { %472 = vmatpush1.bf16.msra.mxu1 %v641_v19  ;;  %432 = vmatprep.subr.bf16.mxu0 %v642_v20  ;;  %v695_v59 = vld [vmem:[%s936_s1 + $0x1a0] ss:$8 sps:$4 sm:$0xff]   ;;  %v696_v60 = vld [vmem:[%s936_s1 + $0x94] ss:$8 sps:$4 sm:$0xff]   ;;  %v700_v62 = vld [vmem:[%s936_s1 + $0x90] ss:$8 sps:$4 sm:$0xff]  }
  0x15   :  { %473 = vmatprep.subr.bf16.mxu1 %v644_v21  ;;  %454 = vmatprep.mubr.bf16.mxu0 %v543_v47  ;;  %v698_v61 = vld [vmem:[%s936_s1 + $0x194] ss:$8 sps:$4 sm:$0xff]   ;;  %v701_v63 = vld [vmem:[%s936_s1 + $0x190] ss:$8 sps:$4 sm:$0xff]   ;;  %v702_v0 = vld [vmem:[%s936_s1 + $0x84] ss:$8 sps:$4 sm:$0xff]  }
  0x16   :  { %495 = vmatprep.mubr.bf16.mxu1 %v545_v51  ;;  %v704_v1 = vld [vmem:[%s936_s1 + $0x184] ss:$8 sps:$4 sm:$0xff]   ;;  %v706_v2 = vld [vmem:[%s936_s1 + $0x80] ss:$8 sps:$4 sm:$0xff]   ;;  %v517_v8 = vsub.s32 0, %v516_v7  ;;  %v521_v10 = vsub.s32 1, %v516_v7 }
  0x17   :  { %433 = vmatpush1.bf16.msra.mxu0 %v646_v22  ;;  %v707_v3 = vld [vmem:[%s936_s1 + $0x180] ss:$8 sps:$4 sm:$0xff]  }
  0x18   :  { %474 = vmatpush1.bf16.msra.mxu1 %v647_v23  ;;  %434 = vmatprep.subr.bf16.mxu0 %v648_v24  ;;  %v513_v9 = vld [vmem:[%s938_s2] sm:$0x3] }
  0x19   :  { %475 = vmatprep.subr.bf16.mxu1 %v650_v25  ;;  %v518_v11 = vrot.slane %v513_v9, %v517_v8  ;;  %v522_v15 = vrot.slane %v513_v9, %v521_v10 }
  0x1b   :  { %435 = vmatpush1.bf16.msra.mxu0 %v652_v26 }
  0x1c   :  { %476 = vmatpush1.bf16.msra.mxu1 %v653_v27  ;;  %436 = vmatprep.subr.bf16.mxu0 %v654_v28 }
  0x1d   :  { %477 = vmatprep.subr.bf16.mxu1 %v656_v29 }
  0x1f   :  { %437 = vmatpush1.bf16.msra.mxu0 %v658_v30 }
  0x20   :  { %478 = vmatpush1.bf16.msra.mxu1 %v659_v31  ;;  %438 = vmatprep.subr.bf16.mxu0 %v660_v32 }
  0x21   :  { %479 = vmatprep.subr.bf16.mxu1 %v662_v33 }
  0x23   :  { %439 = vmatpush2.bf16.msra.mxu0 %v664_v34 }
  0x24   :  { %480 = vmatpush2.bf16.msra.mxu1 %v665_v35  ;;  %440 = vmatprep.subr.bf16.mxu0 %v666_v36 }
  0x25   :  { %481 = vmatprep.subr.bf16.mxu1 %v668_v37 }
  0x27   :  { %441 = vmatpush2.bf16.msra.mxu0 %v670_v38 }
  0x28   :  { %482 = vmatpush2.bf16.msra.mxu1 %v671_v39  ;;  %442 = vmatprep.subr.bf16.mxu0 %v672_v40 }
  0x29   :  { %483 = vmatprep.subr.bf16.mxu1 %v674_v41 }
  0x2b   :  { %443 = vmatpush2.bf16.msra.mxu0 %v676_v42 }
  0x2c   :  { %484 = vmatpush2.bf16.msra.mxu1 %v677_v43  ;;  %444 = vmatprep.subr.bf16.mxu0 %v678_v44 }
  0x2d   :  { %485 = vmatprep.subr.bf16.mxu1 %v680_v45 }
  0x2f   :  { %445 = vmatpush2.bf16.msra.mxu0 %v682_v49 }
  0x30   :  { %486 = vmatpush2.bf16.msra.mxu1 %v683_v50  ;;  %446 = vmatprep.subr.bf16.mxu0 %v684_v52 }
  0x31   :  { %487 = vmatprep.subr.bf16.mxu1 %v686_v53 }
  0x33   :  { %447 = vmatpush2.bf16.msra.mxu0 %v688_v54 }
  0x34   :  { %488 = vmatpush2.bf16.msra.mxu1 %v689_v55  ;;  %448 = vmatprep.subr.bf16.mxu0 %v690_v56 }
  0x35   :  { %489 = vmatprep.subr.bf16.mxu1 %v692_v57 }
  0x37   :  { %449 = vmatpush2.bf16.msra.mxu0 %v694_v58 }
  0x38   :  { %490 = vmatpush2.bf16.msra.mxu1 %v695_v59  ;;  %450 = vmatprep.subr.bf16.mxu0 %v696_v60 }
  0x39   :  { %491 = vmatprep.subr.bf16.mxu1 %v698_v61 }
  0x3b   :  { %451 = vmatpush2.bf16.msra.mxu0 %v700_v62 }
  0x3c   :  { %492 = vmatpush2.bf16.msra.mxu1 %v701_v63  ;;  %452 = vmatprep.subr.bf16.mxu0 %v702_v0 }
  0x3d   :  { %493 = vmatprep.subr.bf16.mxu1 %v704_v1 }
  0x3f   :  { %453 = vmatpush2.bf16.msra.mxu0 %v706_v2 }
  0x40   :  { %494 = vmatpush2.bf16.msra.mxu1 %v707_v3 }
  0x42   :  { %455 = vmatmul.mubr.bf16.vlgmr.msra.gmra.mxu0 %v542_v4 }
  0x43   :  { %496 = vmatmul.mubr.bf16.vlgmr.msra.gmra.mxu1 %v544_v5 }
 0x102   :  { %v456_v12 = vpop.f32.mrf.mxu0 }
 0x103   :  { %v497_v13 = vpop.f32.mrf.mxu1 }
 0x104   :  { %v498_v14 = vadd.f32 %v497_v13, %v456_v12  ;;  %v458_v16 = vpop.f32.mrf.mxu0 }
 0x105   :  { %v499_v17 = vpop.f32.mrf.mxu1 }
 0x106   :  { %v525_v18 = vadd.f32 %v518_v11, %v498_v14  ;;  %v500_v19 = vadd.f32 %v499_v17, %v458_v16  ;;  %v460_v20 = vpop.f32.mrf.mxu0 }
 0x107   :  { %v501_v21 = vpop.f32.mrf.mxu1 }
 0x108   :  { %v526_v22 = vadd.f32 %v522_v15, %v500_v19  ;;  %v461_v23 = vpop.f32.mrf.mxu0  ;;  %v527_v25 = vmax.f32 %v525_v18, 0.0 }
 0x109   :  { %v502_v24 = vpop.f32.mrf.mxu1 }
 0x10a   :  { %v528_v26 = vmax.f32 %v526_v22, 0.0 }
 0x10c   :  { %v611_v27 = vpack.c.bf16 %v528_v26, %v527_v25 }
 0x10e   :  { %537 = vst [vmem:[%s939_s3] sm:$0xff] %v611_v27 }

// kernel: spectrogram_vae_forward.14
= control target key start
LH: loop header
LB: loop body
LE: loop exit
PB: predicated region body
PF: predicated region fallthrough
CT: control target
= control target key end

     0   :  { %s477_s1 = inlined_call_operand.vmem [shape: bf16[256,128], index: 1, kind: input, shape index: {}]   ;;  %s478_s0 = inlined_call_operand.vmem [shape: bf16[32,256], index: 0, kind: input, shape index: {}]   ;;  %s479_s2 = inlined_call_operand.vmem [shape: f32[1,128], index: 2, kind: input, shape index: {}]   ;;  %s480_s3 = inlined_call_operand.vmem [shape: bf16[32,128], index: 3, kind: output, shape index: {}]  }
   0x1   :  { %v366_v0 = vld [vmem:[%s477_s1 + $0x78] sm:$0xff]   ;;  %v368_v2 = vld [vmem:[%s477_s1 + $0x70] sm:$0xff]   ;;  %v370_v4 = vld [vmem:[%s477_s1 + $0x68] sm:$0xff]  }
   0x2   :  { %v367_v1 = vld [vmem:[%s477_s1 + $0x38] sm:$0xff]   ;;  %322 = vmatprep.subr.bf16.mxu0 %v366_v0  ;;  %350 = vmatprep.subr.bf16.mxu1 %v366_v0  ;;  %v369_v3 = vld [vmem:[%s477_s1 + $0x30] sm:$0xff]   ;;  %v371_v5 = vld [vmem:[%s477_s1 + $0x28] sm:$0xff]  }
   0x3   :  { %323 = vmatpush3.bf16.msra.mxu0 %v367_v1  ;;  %358 = vmatpush3.bf16.msra.mxu1 %v367_v1  ;;  %v372_v6 = vld [vmem:[%s477_s1 + $0x60] sm:$0xff]   ;;  %v374_v8 = vld [vmem:[%s477_s1 + $0x58] sm:$0xff]   ;;  %v376_v10 = vld [vmem:[%s477_s1 + $0x50] sm:$0xff]  }
   0x4   :  { %324 = vmatprep.subr.bf16.mxu0 %v368_v2  ;;  %351 = vmatprep.subr.bf16.mxu1 %v368_v2  ;;  %v373_v7 = vld [vmem:[%s477_s1 + $0x20] sm:$0xff]   ;;  %v375_v9 = vld [vmem:[%s477_s1 + $0x18] sm:$0xff]   ;;  %v377_v13 = vld [vmem:[%s477_s1 + $0x10] sm:$0xff]  }
   0x5   :  { %v384_v11 = vld [vmem:[%s478_s0 + $0x4] ss:$8 sps:$4 sm:$0xff]   ;;  %v387_v12 = vld [vmem:[%s478_s0 + $0x14] ss:$8 sps:$4 sm:$0xff]   ;;  %v382_v18 = vld [vmem:[%s478_s0] ss:$8 sps:$4 sm:$0xff]  }
   0x6   :  { %v378_v14 = vld [vmem:[%s477_s1 + $0x48] sm:$0xff]   ;;  %211 = vmatprep.mubr.bf16.mxu0 %v384_v11  ;;  %219 = vmatprep.mubr.bf16.mxu1 %v387_v12  ;;  %v380_v16 = vld [vmem:[%s477_s1 + $0x40] sm:$0xff]   ;;  %v385_v19 = vld [vmem:[%s478_s0 + $0x10] ss:$8 sps:$4 sm:$0xff]  }
   0x7   :  { %325 = vmatpush3.bf16.msra.mxu0 %v369_v3  ;;  %359 = vmatpush3.bf16.msra.mxu1 %v369_v3  ;;  %v379_v15 = vld [vmem:[%s477_s1 + $0x8] sm:$0xff]   ;;  %v381_v17 = vld [vmem:[%s477_s1] sm:$0xff]  }
   0x8   :  { %326 = vmatprep.subr.bf16.mxu0 %v370_v4  ;;  %352 = vmatprep.subr.bf16.mxu1 %v370_v4  ;;  %v302_v26 = vld [vmem:[%s479_s2] ss:$0 sm:$0xff] }
   0xb   :  { %327 = vmatpush3.bf16.msra.mxu0 %v371_v5  ;;  %360 = vmatpush3.bf16.msra.mxu1 %v371_v5 }
   0xc   :  { %328 = vmatprep.subr.bf16.mxu0 %v372_v6  ;;  %353 = vmatprep.subr.bf16.mxu1 %v372_v6 }
   0xf   :  { %329 = vmatpush3.bf16.msra.mxu0 %v373_v7  ;;  %361 = vmatpush3.bf16.msra.mxu1 %v373_v7 }
  0x10   :  { %330 = vmatprep.subr.bf16.mxu0 %v374_v8  ;;  %354 = vmatprep.subr.bf16.mxu1 %v374_v8 }
  0x13   :  { %331 = vmatpush3.bf16.msra.mxu0 %v375_v9  ;;  %362 = vmatpush3.bf16.msra.mxu1 %v375_v9 }
  0x14   :  { %332 = vmatprep.subr.bf16.mxu0 %v376_v10  ;;  %355 = vmatprep.subr.bf16.mxu1 %v376_v10 }
  0x17   :  { %333 = vmatpush3.bf16.msra.mxu0 %v377_v13  ;;  %363 = vmatpush3.bf16.msra.mxu1 %v377_v13 }
  0x18   :  { %334 = vmatprep.subr.bf16.mxu0 %v378_v14  ;;  %356 = vmatprep.subr.bf16.mxu1 %v378_v14 }
  0x1b   :  { %335 = vmatpush3.bf16.msra.mxu0 %v379_v15  ;;  %364 = vmatpush3.bf16.msra.mxu1 %v379_v15 }
  0x1c   :  { %336 = vmatprep.subr.bf16.mxu0 %v380_v16  ;;  %357 = vmatprep.subr.bf16.mxu1 %v380_v16 }
  0x1f   :  { %337 = vmatpush3.bf16.msra.mxu0 %v381_v17  ;;  %365 = vmatpush3.bf16.msra.mxu1 %v381_v17 }
  0x22   :  { %212 = vmatmul.mubr.bf16.vlgmr.msra.gmra.mxu0 %v382_v18  ;;  %220 = vmatmul.mubr.bf16.vlgmr.msra.gmra.mxu1 %v385_v19 }
  0xe2   :  { %v338_v20 = vpop.f32.mrf.mxu0  ;;  %v344_v21 = vpop.f32.mrf.mxu1 }
  0xe4   :  { %v339_v22 = vpop.f32.mrf.mxu0  ;;  %v345_v23 = vpop.f32.mrf.mxu1 }
  0xe5   :  { %v340_v24 = vadd.f32 %v339_v22, %v338_v20  ;;  %v346_v25 = vadd.f32 %v345_v23, %v344_v21 }
  0xe6   :  { %v341_v27 = vpop.f32.mrf.mxu0  ;;  %v347_v28 = vpop.f32.mrf.mxu1 }
  0xe7   :  { %v250_v31 = vadd.f32 %v340_v24, %v302_v26  ;;  %v252_v32 = vadd.f32 %v346_v25, %v302_v26 }
  0xe8   :  { %v342_v29 = vpop.f32.mrf.mxu0  ;;  %v348_v30 = vpop.f32.mrf.mxu1 }
  0xe9   :  { %v343_v33 = vadd.f32 %v342_v29, %v341_v27  ;;  %v349_v34 = vadd.f32 %v348_v30, %v347_v28  ;;  %v254_v37 = vmax.f32 %v250_v31, 0.0  ;;  %v256_v38 = vmax.f32 %v252_v32, 0.0 }
  0xeb   :  { %v251_v35 = vadd.f32 %v343_v33, %v302_v26  ;;  %v253_v36 = vadd.f32 %v349_v34, %v302_v26 }
  0xed   :  { %v255_v39 = vmax.f32 %v251_v35, 0.0  ;;  %v257_v40 = vmax.f32 %v253_v36, 0.0 }
  0xef   :  { %v314_v41 = vpack.c.bf16 %v255_v39, %v254_v37  ;;  %v319_v42 = vpack.c.bf16 %v257_v40, %v256_v38 }
  0xf1   :  { %315 = vst [vmem:[%s480_s3] sm:$0xff] %v314_v41   ;;  %321 = vst [vmem:[%s480_s3 + $0x8] sm:$0xff] %v319_v42  }

// kernel: spectrogram_vae_forward.15
= control target key start
LH: loop header
LB: loop body
LE: loop exit
PB: predicated region body
PF: predicated region fallthrough
CT: control target
= control target key end

     0   :  { %s762_s1 = inlined_call_operand.vmem [shape: bf16[128,128], index: 1, kind: input, shape index: {}]   ;;  %s763_s0 = inlined_call_operand.vmem [shape: bf16[128,128], index: 0, kind: input, shape index: {}]   ;;  %s764_s2 = inlined_call_operand.vmem [shape: f32[1,128], index: 2, kind: input, shape index: {}]   ;;  %s765_s3 = inlined_call_operand.vmem [shape: f32[128,128], index: 3, kind: output, shape index: {}]  }
   0x1   :  { %v563_v0 = vld [vmem:[%s762_s1 + $0x38] sm:$0xff]   ;;  %v564_v1 = vld [vmem:[%s762_s1 + $0x30] sm:$0xff]   ;;  %v565_v2 = vld [vmem:[%s762_s1 + $0x28] sm:$0xff]  }
   0x2   :  { %515 = vmatprep.subr.bf16.mxu0 %v563_v0  ;;  %547 = vmatprep.subr.bf16.mxu1 %v563_v0  ;;  %v566_v3 = vld [vmem:[%s762_s1 + $0x20] sm:$0xff]   ;;  %v567_v6 = vld [vmem:[%s762_s1 + $0x18] sm:$0xff]   ;;  %v568_v7 = vld [vmem:[%s762_s1 + $0x10] sm:$0xff]  }
   0x3   :  { %516 = vmatpush3.bf16.msra.mxu0 %v563_v0  ;;  %555 = vmatpush3.bf16.msra.mxu1 %v563_v0  ;;  %v571_v4 = vld [vmem:[%s763_s0] sm:$0xff]   ;;  %v569_v8 = vld [vmem:[%s762_s1 + $0x8] sm:$0xff]   ;;  %v575_v12 = vld [vmem:[%s763_s0 + $0x10] sm:$0xff]  }
   0x4   :  { %517 = vmatprep.subr.bf16.mxu0 %v564_v1  ;;  %548 = vmatprep.subr.bf16.mxu1 %v564_v1  ;;  %v572_v5 = vld [vmem:[%s763_s0 + $0x20] sm:$0xff]   ;;  %v573_v10 = vld [vmem:[%s763_s0 + $0x8] sm:$0xff]   ;;  %v576_v13 = vld [vmem:[%s763_s0 + $0x30] sm:$0xff]  }
   0x5   :  { %531 = vmatprep.mubr.bf16.mxu0 %v571_v4  ;;  %539 = vmatprep.mubr.bf16.mxu1 %v572_v5  ;;  %v570_v9 = vld [vmem:[%s762_s1] sm:$0xff]   ;;  %v574_v11 = vld [vmem:[%s763_s0 + $0x28] sm:$0xff]   ;;  %v577_v14 = vld [vmem:[%s763_s0 + $0x18] sm:$0xff]  }
   0x6   :  { %v578_v15 = vld [vmem:[%s763_s0 + $0x38] sm:$0xff]   ;;  %v482_v16 = vld [vmem:[%s764_s2] ss:$0 sm:$0xff] }
   0x7   :  { %518 = vmatpush3.bf16.msra.mxu0 %v564_v1  ;;  %556 = vmatpush3.bf16.msra.mxu1 %v564_v1 }
   0x8   :  { %519 = vmatprep.subr.bf16.mxu0 %v565_v2  ;;  %549 = vmatprep.subr.bf16.mxu1 %v565_v2 }
   0xb   :  { %520 = vmatpush3.bf16.msra.mxu0 %v565_v2  ;;  %557 = vmatpush3.bf16.msra.mxu1 %v565_v2 }
   0xc   :  { %521 = vmatprep.subr.bf16.mxu0 %v566_v3  ;;  %550 = vmatprep.subr.bf16.mxu1 %v566_v3 }
   0xf   :  { %522 = vmatpush3.bf16.msra.mxu0 %v566_v3  ;;  %558 = vmatpush3.bf16.msra.mxu1 %v566_v3 }
  0x10   :  { %523 = vmatprep.subr.bf16.mxu0 %v567_v6  ;;  %551 = vmatprep.subr.bf16.mxu1 %v567_v6 }
  0x13   :  { %524 = vmatpush3.bf16.msra.mxu0 %v567_v6  ;;  %559 = vmatpush3.bf16.msra.mxu1 %v567_v6 }
  0x14   :  { %525 = vmatprep.subr.bf16.mxu0 %v568_v7  ;;  %552 = vmatprep.subr.bf16.mxu1 %v568_v7 }
  0x17   :  { %526 = vmatpush3.bf16.msra.mxu0 %v568_v7  ;;  %560 = vmatpush3.bf16.msra.mxu1 %v568_v7 }
  0x18   :  { %527 = vmatprep.subr.bf16.mxu0 %v569_v8  ;;  %553 = vmatprep.subr.bf16.mxu1 %v569_v8 }
  0x1b   :  { %528 = vmatpush3.bf16.msra.mxu0 %v569_v8  ;;  %561 = vmatpush3.bf16.msra.mxu1 %v569_v8 }
  0x1c   :  { %529 = vmatprep.subr.bf16.mxu0 %v570_v9  ;;  %554 = vmatprep.subr.bf16.mxu1 %v570_v9 }
  0x1f   :  { %530 = vmatpush3.bf16.msra.mxu0 %v570_v9  ;;  %562 = vmatpush3.bf16.msra.mxu1 %v570_v9 }
  0x22   :  { %532 = vmatmul.mubr.bf16.vlgmr.msra.gmra.mxu0 %v573_v10  ;;  %540 = vmatmul.mubr.bf16.vlgmr.msra.gmra.mxu1 %v574_v11 }
  0x23   :  { %535 = vmatprep.mubr.bf16.mxu0 %v575_v12  ;;  %543 = vmatprep.mubr.bf16.mxu1 %v576_v13 }
  0x2a   :  { %536 = vmatmul.mubr.bf16.gmra.mxu0 %v577_v14  ;;  %544 = vmatmul.mubr.bf16.gmra.mxu1 %v578_v15 }
  0xe2   :  { %v533_v17 = vpop.f32.mrf.mxu0  ;;  %v541_v18 = vpop.f32.mrf.mxu1 }
  0xe3   :  { %v336_v19 = vadd.f32 %v533_v17, %v482_v16  ;;  %v344_v20 = vadd.f32 %v541_v18, %v482_v16 }
  0xe4   :  { %v213_v21 = vpop.f32.mrf.mxu0  ;;  %v245_v22 = vpop.f32.mrf.mxu1 }
  0xe5   :  { %v485_v23 = vmul.f32 -1.442695, %v336_v19  ;;  %v493_v24 = vmul.f32 -1.442695, %v344_v20  ;;  %v334_v25 = vadd.f32 %v482_v16, %v213_v21  ;;  %v342_v26 = vadd.f32 %v482_v16, %v245_v22 }
  0xe6   :  { %v534_v27 = vpop.f32.mrf.mxu0  ;;  %v542_v28 = vpop.f32.mrf.mxu1 }
  0xe7   :  { %579 = vpow2.f32 %v485_v23  ;;  %v483_v29 = vmul.f32 -1.442695, %v334_v25  ;;  %v491_v30 = vmul.f32 -1.442695, %v342_v26  ;;  %v337_v31 = vadd.f32 %v534_v27, %v482_v16 }
  0xe8   :  { %581 = vpow2.f32 %v493_v24  ;;  %v345_v32 = vadd.f32 %v542_v28, %v482_v16  ;;  %v216_v33 = vpop.f32.mrf.mxu0  ;;  %v248_v34 = vpop.f32.mrf.mxu1 }
  0xe9   :  { %583 = vpow2.f32 %v483_v29  ;;  %v486_v35 = vmul.f32 -1.442695, %v337_v31  ;;  %v335_v36 = vadd.f32 %v482_v16, %v216_v33  ;;  %v343_v37 = vadd.f32 %v482_v16, %v248_v34 }
  0xea   :  { %585 = vpow2.f32 %v491_v30  ;;  %v494_v38 = vmul.f32 -1.442695, %v345_v32  ;;  %v537_v39 = vpop.f32.mrf.mxu0  ;;  %v545_v40 = vpop.f32.mrf.mxu1 }
  0xeb   :  { %587 = vpow2.f32 %v486_v35  ;;  %v484_v41 = vmul.f32 -1.442695, %v335_v36  ;;  %v492_v42 = vmul.f32 -1.442695, %v343_v37  ;;  %v340_v43 = vadd.f32 %v537_v39, %v482_v16 }
  0xec   :  { %589 = vpow2.f32 %v494_v38  ;;  %v348_v44 = vadd.f32 %v545_v40, %v482_v16  ;;  %v229_v45 = vpop.f32.mrf.mxu0  ;;  %v261_v46 = vpop.f32.mrf.mxu1 }
  0xed   :  { %591 = vpow2.f32 %v484_v41  ;;  %v489_v47 = vmul.f32 -1.442695, %v340_v43  ;;  %v338_v48 = vadd.f32 %v482_v16, %v229_v45  ;;  %v346_v49 = vadd.f32 %v482_v16, %v261_v46 }
  0xee   :  { %593 = vpow2.f32 %v492_v42  ;;  %v497_v50 = vmul.f32 -1.442695, %v348_v44  ;;  %v538_v51 = vpop.f32.mrf.mxu0  ;;  %v546_v52 = vpop.f32.mrf.mxu1 }
  0xef   :  { %595 = vpow2.f32 %v489_v47  ;;  %v487_v53 = vmul.f32 -1.442695, %v338_v48  ;;  %v495_v54 = vmul.f32 -1.442695, %v346_v49  ;;  %v341_v55 = vadd.f32 %v538_v51, %v482_v16 }
  0xf0   :  { %597 = vpow2.f32 %v497_v50  ;;  %v349_v56 = vadd.f32 %v546_v52, %v482_v16  ;;  %v232_v57 = vpop.f32.mrf.mxu0  ;;  %v264_v58 = vpop.f32.mrf.mxu1 }
  0xf1   :  { %599 = vpow2.f32 %v487_v53  ;;  %v490_v59 = vmul.f32 -1.442695, %v341_v55  ;;  %v339_v60 = vadd.f32 %v482_v16, %v232_v57  ;;  %v347_v61 = vadd.f32 %v482_v16, %v264_v58 }
  0xf2   :  { %601 = vpow2.f32 %v495_v54  ;;  %v498_v62 = vmul.f32 -1.442695, %v349_v56 }
  0xf3   :  { %603 = vpow2.f32 %v490_v59  ;;  %v488_v63 = vmul.f32 -1.442695, %v339_v60  ;;  %v496_v0 = vmul.f32 -1.442695, %v347_v61 }
  0xf4   :  { %v580_v1 = vpop.eup %579  ;;  %605 = vpow2.f32 %v498_v62 }
  0xf5   :  { %v582_v2 = vpop.eup %581  ;;  %v400_v3 = vadd.f32 1.0, %v580_v1  ;;  %607 = vpow2.f32 %v488_v63 }
  0xf6   :  { %v584_v4 = vpop.eup %583  ;;  %v408_v5 = vadd.f32 1.0, %v582_v2  ;;  %609 = vpow2.f32 %v496_v0 }
  0xf7   :  { %v586_v6 = vpop.eup %585  ;;  %611 = vrcp.f32 %v400_v3  ;;  %v398_v7 = vadd.f32 1.0, %v584_v4 }
  0xf8   :  { %v588_v8 = vpop.eup %587  ;;  %613 = vrcp.f32 %v408_v5  ;;  %v406_v9 = vadd.f32 1.0, %v586_v6 }
  0xf9   :  { %v590_v10 = vpop.eup %589  ;;  %615 = vrcp.f32 %v398_v7  ;;  %v401_v11 = vadd.f32 1.0, %v588_v8 }
  0xfa   :  { %v592_v12 = vpop.eup %591  ;;  %617 = vrcp.f32 %v406_v9  ;;  %v409_v13 = vadd.f32 1.0, %v590_v10 }
  0xfb   :  { %v594_v14 = vpop.eup %593  ;;  %619 = vrcp.f32 %v401_v11  ;;  %v399_v15 = vadd.f32 1.0, %v592_v12 }
  0xfc   :  { %v596_v16 = vpop.eup %595  ;;  %621 = vrcp.f32 %v409_v13  ;;  %v407_v17 = vadd.f32 1.0, %v594_v14 }
  0xfd   :  { %v598_v18 = vpop.eup %597  ;;  %623 = vrcp.f32 %v399_v15  ;;  %v404_v19 = vadd.f32 1.0, %v596_v16 }
  0xfe   :  { %v600_v20 = vpop.eup %599  ;;  %625 = vrcp.f32 %v407_v17  ;;  %v412_v21 = vadd.f32 1.0, %v598_v18 }
  0xff   :  { %v602_v22 = vpop.eup %601  ;;  %627 = vrcp.f32 %v404_v19  ;;  %v402_v23 = vadd.f32 1.0, %v600_v20 }
 0x100   :  { %v604_v24 = vpop.eup %603  ;;  %629 = vrcp.f32 %v412_v21  ;;  %v410_v25 = vadd.f32 1.0, %v602_v22 }
 0x101   :  { %v606_v26 = vpop.eup %605  ;;  %631 = vrcp.f32 %v402_v23  ;;  %v405_v27 = vadd.f32 1.0, %v604_v24 }
 0x102   :  { %v608_v28 = vpop.eup %607  ;;  %633 = vrcp.f32 %v410_v25  ;;  %v413_v29 = vadd.f32 1.0, %v606_v26 }
 0x103   :  { %v610_v30 = vpop.eup %609  ;;  %635 = vrcp.f32 %v405_v27  ;;  %v403_v31 = vadd.f32 1.0, %v608_v28 }
 0x104   :  { %v612_v32 = vpop.eup %611  ;;  %637 = vrcp.f32 %v413_v29  ;;  %v411_v33 = vadd.f32 1.0, %v610_v30 }
 0x105   :  { %v614_v34 = vpop.eup %613  ;;  %448 = vst [vmem:[%s765_s3 + $0x10] sm:$0xff] %v612_v32  ;;  %639 = vrcp.f32 %v403_v31 }
 0x106   :  { %v616_v35 = vpop.eup %615  ;;  %456 = vst [vmem:[%s765_s3 + $0x50] sm:$0xff] %v614_v34  ;;  %641 = vrcp.f32 %v411_v33 }
 0x107   :  { %v618_v36 = vpop.eup %617  ;;  %446 = vst [vmem:[%s765_s3] sm:$0xff] %v616_v35 }
 0x108   :  { %v620_v37 = vpop.eup %619  ;;  %454 = vst [vmem:[%s765_s3 + $0x40] sm:$0xff] %v618_v36 }
 0x109   :  { %v622_v38 = vpop.eup %621  ;;  %449 = vst [vmem:[%s765_s3 + $0x18] sm:$0xff] %v620_v37 }
 0x10a   :  { %v624_v39 = vpop.eup %623  ;;  %457 = vst [vmem:[%s765_s3 + $0x58] sm:$0xff] %v622_v38 }
 0x10b   :  { %v626_v40 = vpop.eup %625  ;;  %447 = vst [vmem:[%s765_s3 + $0x8] sm:$0xff] %v624_v39 }
 0x10c   :  { %v628_v41 = vpop.eup %627  ;;  %455 = vst [vmem:[%s765_s3 + $0x48] sm:$0xff] %v626_v40 }
 0x10d   :  { %v630_v42 = vpop.eup %629  ;;  %452 = vst [vmem:[%s765_s3 + $0x30] sm:$0xff] %v628_v41 }
 0x10e   :  { %v632_v43 = vpop.eup %631  ;;  %460 = vst [vmem:[%s765_s3 + $0x70] sm:$0xff] %v630_v42 }
 0x10f   :  { %v634_v44 = vpop.eup %633  ;;  %450 = vst [vmem:[%s765_s3 + $0x20] sm:$0xff] %v632_v43 }
 0x110   :  { %v636_v45 = vpop.eup %635  ;;  %458 = vst [vmem:[%s765_s3 + $0x60] sm:$0xff] %v634_v44 }
 0x111   :  { %v638_v46 = vpop.eup %637  ;;  %453 = vst [vmem:[%s765_s3 + $0x38] sm:$0xff] %v636_v45 }
 0x112   :  { %v640_v47 = vpop.eup %639  ;;  %461 = vst [vmem:[%s765_s3 + $0x78] sm:$0xff] %v638_v46 }
 0x113   :  { %v642_v48 = vpop.eup %641  ;;  %451 = vst [vmem:[%s765_s3 + $0x28] sm:$0xff] %v640_v47 }
 0x114   :  { %459 = vst [vmem:[%s765_s3 + $0x68] sm:$0xff] %v642_v48 }

</bundles_post_ra>
